<compile_context>
chip_gen: v7x
topology: tpu7x:2x2x1
jax: 0.10.0
libtpu: 0.0.40
codegen_flags: <defaults>
</compile_context>

<pallas_src>
import functools

import jax
import jax.numpy as jnp
from jax.experimental import pallas as pl
from jax.experimental.pallas import tpu as pltpu


def _layernorm(x, gamma, beta, eps=1e-5):
    mu = jnp.mean(x, axis=-1, keepdims=True)
    var = jnp.mean((x - mu) ** 2, axis=-1, keepdims=True)
    return (x - mu) * jax.lax.rsqrt(var + eps) * gamma + beta


def block_kernel(x_ref,
                 ln1_g_ref, ln1_b_ref,
                 wq_ref, wkv_ref, wp_ref, bp_ref,
                 ln2_g_ref, ln2_b_ref,
                 w1_ref, b1_ref, w2_ref, b2_ref,
                 o_ref,
                 x1_scr, k_scr, v_scr,
                 *, num_heads, tq, approx_recip=True):
    f32, bf16 = jnp.float32, jnp.bfloat16
    T, E = x_ref.shape[1], x_ref.shape[2]
    hs = E // num_heads
    qi = pl.program_id(1)

    # ---- Once per batch element (qi == 0): LN1 + fused K/V projection ----
    @pl.when(qi == 0)
    def _():
        x_full = x_ref[0].astype(f32)                               # (T, E)
        x1_full = _layernorm(x_full, ln1_g_ref[0], ln1_b_ref[0])    # f32 stats
        x1_scr[...] = x1_full
        kv = jnp.dot(x1_full.astype(bf16), wkv_ref[...],
                     preferred_element_type=f32)                    # (T, 2E)
        k_scr[...] = kv[:, :E].astype(bf16)
        v_scr[...] = kv[:, E:].astype(bf16)

    # ---- Per query tile ----
    q_start = pl.multiple_of(qi * tq, tq)
    x1_t = x1_scr[pl.ds(q_start, tq), :]                            # (tq, E) f32
    # Full-width Q projection (scale already folded into Wq).
    q_t = jnp.dot(x1_t.astype(bf16), wq_ref[...], preferred_element_type=f32)

    # Additive causal mask for this tile (f32; -1e30 is safe in f32 only).
    row = jax.lax.broadcasted_iota(jnp.int32, (tq, T), 0) + qi * tq
    col = jax.lax.broadcasted_iota(jnp.int32, (tq, T), 1)
    mask_add = jnp.where(col <= row, 0.0, -1e30).astype(f32)        # (tq, T)

    # ---- Per-head attention (only the inherently head-local dots remain) ----
    head_outs = []
    for h in range(num_heads):                                      # small static unroll
        q_h = q_t[:, h * hs:(h + 1) * hs].astype(bf16)              # (tq, hs)
        k_h = k_scr[:, h * hs:(h + 1) * hs]                         # (T, hs) bf16
        v_h = v_scr[:, h * hs:(h + 1) * hs]                         # (T, hs) bf16
        # scores = q_h @ k_h^T via the transposed-RHS contraction (no XLU transpose).
        scores = jax.lax.dot_general(
            q_h, k_h, dimension_numbers=(((1,), (1,)), ((), ())),
            preferred_element_type=f32) + mask_add                  # (tq, T) f32
        m = jnp.max(scores, axis=-1, keepdims=True)
        p = jnp.exp(scores - m)
        denom = jnp.sum(p, axis=-1, keepdims=True)
        if approx_recip:
            p = p * pl.reciprocal(denom, approx=True)               # EUP slot
        else:
            p = p / denom
        head_outs.append(jnp.dot(p.astype(bf16), v_h,
                                 preferred_element_type=f32))       # (tq, hs)

    # Lane-contiguous packed head outputs -> ONE full-width output projection.
    attn_packed = jnp.concatenate(head_outs, axis=-1)               # (tq, E) f32
    attn = jnp.dot(attn_packed.astype(bf16), wp_ref[...],
                   preferred_element_type=f32) + bp_ref[0]

    # Residual around attention (applied to the post-LN1 activation, as in the module).
    x2 = x1_t + attn

    # ---- LayerNorm 2 + FeedForward (Linear -> ReLU -> Linear) ----
    x3 = _layernorm(x2, ln2_g_ref[0], ln2_b_ref[0])
    h1 = jnp.dot(x3.astype(bf16), w1_ref[...], preferred_element_type=f32) + b1_ref[0]
    h1 = jnp.maximum(h1, 0.0)
    mlp = jnp.dot(h1.astype(bf16), w2_ref[...], preferred_element_type=f32) + b2_ref[0]

    o_ref[0] = (x3 + mlp).astype(o_ref.dtype)                       # residual around MLP


def block_forward(x, kparams, *, num_heads, tq=None):
    B, T, E = x.shape
    H4 = 4 * E
    if tq is None:
        tq = min(T, 128)
    assert T % tq == 0 and tq % 8 == 0, "query tile must divide T and be sublane-aligned"
    assert E % num_heads == 0
    n_tq = T // tq

    def w_spec(shape):
        # Grid-invariant weight/bias block: single-buffer it (double-buffering a
        # constant block only costs VMEM with zero pipelining benefit).
        zeros = (0,) * len(shape)
        kwargs = {}
        if hasattr(pl, "Buffered"):
            kwargs["pipeline_mode"] = pl.Buffered(1)
        return pl.BlockSpec(shape, lambda b, qi, _z=zeros: _z, **kwargs)

    kernel = functools.partial(block_kernel, num_heads=num_heads, tq=tq)

    # Advisory cost estimate so XLA can schedule around the custom call.
    flops = B * (2 * T * E * E            # Q projection
                 + 2 * T * E * 2 * E      # fused K/V projection
                 + 4 * T * T * E          # scores + context (summed over heads)
                 + 2 * T * E * E          # output projection
                 + 4 * T * E * H4)        # MLP (two matmuls)
    bytes_accessed = (2 * B * T * E * 2                               # x in + out (bf16)
                      + 2 * (E * E + 2 * E * E + E * E + 2 * E * H4)  # bf16 weights
                      + 4 * (6 * E + H4))                             # f32 biases / LN params
    transcendentals = B * num_heads * T * T

    return pl.pallas_call(
        kernel,
        out_shape=jax.ShapeDtypeStruct((B, T, E), x.dtype),
        grid_spec=pltpu.PrefetchScalarGridSpec(
            num_scalar_prefetch=0,
            grid=(B, n_tq),
            in_specs=[
                # Full sequence per batch element (K/V need every row); the block
                # index is invariant over qi so it is DMA'd once per batch element.
                pl.BlockSpec((1, T, E), lambda b, qi: (b, 0, 0)),
                w_spec((1, E)), w_spec((1, E)),        # ln1 gamma/beta (f32)
                w_spec((E, E)),                        # Wq fused over heads (bf16, scale folded)
                w_spec((E, 2 * E)),                    # Wk|Wv fused (bf16)
                w_spec((E, E)),                        # Wproj (bf16)
                w_spec((1, E)),                        # proj bias (f32)
                w_spec((1, E)), w_spec((1, E)),        # ln2 gamma/beta (f32)
                w_spec((E, H4)), w_spec((1, H4)),      # mlp W1 (bf16), b1 (f32)
                w_spec((H4, E)), w_spec((1, E)),       # mlp W2 (bf16), b2 (f32)
            ],
            out_specs=pl.BlockSpec((1, tq, E), lambda b, qi: (b, qi, 0)),
            scratch_shapes=[
                pltpu.VMEM((T, E), jnp.float32),       # x1 = ln1(x), full sequence
                pltpu.VMEM((T, E), jnp.bfloat16),      # K, full sequence (MXU-ready)
                pltpu.VMEM((T, E), jnp.bfloat16),      # V, full sequence (MXU-ready)
            ],
        ),
        compiler_params=pltpu.CompilerParams(
            # Batch axis feeds both v7x TensorCores; the Tq axis carries the
            # K/V-in-scratch dependency, so it must stay "arbitrary".
            dimension_semantics=("parallel", "arbitrary"),
            vmem_limit_bytes=64 * 1024 * 1024,
        ),
        cost_estimate=pl.CostEstimate(
            flops=flops, transcendentals=transcendentals,
            bytes_accessed=bytes_accessed),
    )(x,
      kparams["ln1_g"], kparams["ln1_b"],
      kparams["wq"], kparams["wkv"], kparams["wp"], kparams["bp"],
      kparams["ln2_g"], kparams["ln2_b"],
      kparams["w1"], kparams["b1"], kparams["w2"], kparams["b2"])


def init_params(key, embedding_size, num_heads):
    """f32 'model' params mirroring the PyTorch module (weights stored (in, out))."""
    E = embedding_size
    hs = E // num_heads
    H4 = 4 * E
    ks = jax.random.split(key, 8)
    s = 0.02
    return {
        "ln1_g": jnp.ones((E,), jnp.float32),
        "ln1_b": jnp.zeros((E,), jnp.float32),
        # Per-head Linear(E, hs, bias=False) weights stacked on a leading head axis.
        "wq": s * jax.random.normal(ks[0], (num_heads, E, hs), jnp.float32),
        "wk": s * jax.random.normal(ks[1], (num_heads, E, hs), jnp.float32),
        "wv": s * jax.random.normal(ks[2], (num_heads, E, hs), jnp.float32),
        "wp": s * jax.random.normal(ks[3], (E, E), jnp.float32),   # (H*hs, E)
        "bp": s * jax.random.normal(ks[4], (E,), jnp.float32),
        "ln2_g": jnp.ones((E,), jnp.float32),
        "ln2_b": jnp.zeros((E,), jnp.float32),
        "w1": s * jax.random.normal(ks[5], (E, H4), jnp.float32),
        "b1": s * jax.random.normal(ks[6], (H4,), jnp.float32),
        "w2": s * jax.random.normal(ks[7], (H4, E), jnp.float32),
        "b2": jnp.zeros((E,), jnp.float32),
    }


def prepare_kernel_params(params, *, num_heads):
    """Fuse per-head weights into full-width bf16 matrices; fold softmax scale into Wq."""
    E = params["wp"].shape[1]
    hs = E // num_heads
    bf16, f32 = jnp.bfloat16, jnp.float32
    scale = hs ** (-0.5)

    def pack_heads(w):  # (H, E, hs) -> (E, H*hs), head-major (matches torch.cat order)
        return jnp.transpose(w, (1, 0, 2)).reshape(E, num_heads * hs)

    wq = pack_heads(params["wq"]) * scale
    wk = pack_heads(params["wk"])
    wv = pack_heads(params["wv"])
    return {
        "ln1_g": params["ln1_g"].reshape(1, E).astype(f32),
        "ln1_b": params["ln1_b"].reshape(1, E).astype(f32),
        "wq": wq.astype(bf16),
        "wkv": jnp.concatenate([wk, wv], axis=-1).astype(bf16),     # (E, 2E)
        "wp": params["wp"].astype(bf16),
        "bp": params["bp"].reshape(1, E).astype(f32),
        "ln2_g": params["ln2_g"].reshape(1, E).astype(f32),
        "ln2_b": params["ln2_b"].reshape(1, E).astype(f32),
        "w1": params["w1"].astype(bf16),
        "b1": params["b1"].reshape(1, -1).astype(f32),
        "w2": params["w2"].astype(bf16),
        "b2": params["b2"].reshape(1, E).astype(f32),
    }


def block_reference(x, params, *, num_heads):
    """Pure-JAX f32 reference (mirrors the PyTorch forward in eval mode)."""
    B, T, E = x.shape
    hs = E // num_heads
    x1 = _layernorm(x, params["ln1_g"], params["ln1_b"])
    mask = jnp.tril(jnp.ones((T, T), bool))
    outs = []
    for h in range(num_heads):
        q = x1 @ params["wq"][h]
        k = x1 @ params["wk"][h]
        v = x1 @ params["wv"][h]
        att = (q @ jnp.swapaxes(k, -1, -2)) * hs ** (-0.5)
        att = jnp.where(mask, att, -jnp.inf)
        att = jax.nn.softmax(att, axis=-1)
        outs.append(att @ v)
    attn = jnp.concatenate(outs, axis=-1) @ params["wp"] + params["bp"]
    x2 = x1 + attn
    x3 = _layernorm(x2, params["ln2_g"], params["ln2_b"])
    mlp = jnp.maximum(x3 @ params["w1"] + params["b1"], 0.0) @ params["w2"] + params["b2"]
    return x3 + mlp


if __name__ == "__main__":
    # TPU-friendly demo shapes: E multiple of 128 (lane-dense), T multiple of 8.
    B, T, E, num_heads = 2, 16, 128, 4

    key = jax.random.PRNGKey(0)
    kx, kp = jax.random.split(key)
    x_f32 = jax.random.normal(kx, (B, T, E), jnp.float32)
    # bf16 activations at the kernel boundary (halves HBM traffic per grid step).
    x_bf = x_f32.astype(jnp.bfloat16)

    params = init_params(kp, E, num_heads)
    kparams = prepare_kernel_params(params, num_heads=num_heads)

    out = block_forward(x_bf, kparams, num_heads=num_heads, tq=8)
    out = jax.block_until_ready(out)

    ref = block_reference(x_bf.astype(jnp.float32), params, num_heads=num_heads)
    assert out.shape == (B, T, E)
    out_f32 = out.astype(jnp.float32)
    max_err = jnp.max(jnp.abs(out_f32 - ref))
    # bf16 I/O + bf16 MXU inputs vs f32 reference: allow small tolerance.
    assert jnp.allclose(out_f32, ref, atol=5e-2, rtol=5e-2), f"mismatch vs reference: {max_err}"

    print("KERNEL_OK")
</pallas_src>

<mosaic_0001>
module attributes {stable_mosaic.version = 11 : i64} {
  func.func @block_kernel(%arg0: i32, %arg1: i32, %arg2: memref<1x16x128xbf16, #tpu.memory_space<vmem>>, %arg3: memref<1x128xf32, #tpu.memory_space<vmem>>, %arg4: memref<1x128xf32, #tpu.memory_space<vmem>>, %arg5: memref<128x128xbf16, #tpu.memory_space<vmem>>, %arg6: memref<128x256xbf16, #tpu.memory_space<vmem>>, %arg7: memref<128x128xbf16, #tpu.memory_space<vmem>>, %arg8: memref<1x128xf32, #tpu.memory_space<vmem>>, %arg9: memref<1x128xf32, #tpu.memory_space<vmem>>, %arg10: memref<1x128xf32, #tpu.memory_space<vmem>>, %arg11: memref<128x512xbf16, #tpu.memory_space<vmem>>, %arg12: memref<1x512xf32, #tpu.memory_space<vmem>>, %arg13: memref<512x128xbf16, #tpu.memory_space<vmem>>, %arg14: memref<1x128xf32, #tpu.memory_space<vmem>>, %arg15: memref<1x8x128xbf16, #tpu.memory_space<vmem>>, %arg16: memref<16x128xf32, #tpu.memory_space<vmem>>, %arg17: memref<16x128xbf16, #tpu.memory_space<vmem>>, %arg18: memref<16x128xbf16, #tpu.memory_space<vmem>>) attributes {dimension_semantics = [#tpu.dimension_semantics<parallel>, #tpu.dimension_semantics<arbitrary>], iteration_bounds = array<i64: 2, 2>, scalar_prefetch = 0 : i64, scratch_operands = 3 : i64, tpu.core_type = #tpu.core_type<tc>, window_params = [{transform_indices = @transform_0, window_bounds = array<i64: 1, 16, 128>}, {pipeline_mode = #tpu.pipeline_mode<synchronous>, transform_indices = @transform_1, window_bounds = array<i64: 1, 128>}, {pipeline_mode = #tpu.pipeline_mode<synchronous>, transform_indices = @transform_2, window_bounds = array<i64: 1, 128>}, {pipeline_mode = #tpu.pipeline_mode<synchronous>, transform_indices = @transform_3, window_bounds = array<i64: 128, 128>}, {pipeline_mode = #tpu.pipeline_mode<synchronous>, transform_indices = @transform_4, window_bounds = array<i64: 128, 256>}, {pipeline_mode = #tpu.pipeline_mode<synchronous>, transform_indices = @transform_5, window_bounds = array<i64: 128, 128>}, {pipeline_mode = #tpu.pipeline_mode<synchronous>, transform_indices = @transform_6, window_bounds = array<i64: 1, 128>}, {pipeline_mode = #tpu.pipeline_mode<synchronous>, transform_indices = @transform_7, window_bounds = array<i64: 1, 128>}, {pipeline_mode = #tpu.pipeline_mode<synchronous>, transform_indices = @transform_8, window_bounds = array<i64: 1, 128>}, {pipeline_mode = #tpu.pipeline_mode<synchronous>, transform_indices = @transform_9, window_bounds = array<i64: 128, 512>}, {pipeline_mode = #tpu.pipeline_mode<synchronous>, transform_indices = @transform_10, window_bounds = array<i64: 1, 512>}, {pipeline_mode = #tpu.pipeline_mode<synchronous>, transform_indices = @transform_11, window_bounds = array<i64: 512, 128>}, {pipeline_mode = #tpu.pipeline_mode<synchronous>, transform_indices = @transform_12, window_bounds = array<i64: 1, 128>}, {transform_indices = @transform_13, window_bounds = array<i64: 1, 8, 128>}]} {
    %c0_i32 = arith.constant 0 : i32
    %0 = arith.cmpi eq, %arg1, %c0_i32 : i32
    %1 = arith.extui %0 : i1 to i32
    %c0_i32_0 = arith.constant 0 : i32
    %2 = arith.cmpi ne, %1, %c0_i32_0 : i32
    scf.if %2 {
      %c0_63 = arith.constant 0 : index
      %c0_64 = arith.constant 0 : index
      %c0_65 = arith.constant 0 : index
      %152 = vector.load %arg2[%c0_63, %c0_64, %c0_65] : memref<1x16x128xbf16, #tpu.memory_space<vmem>>, vector<1x16x128xbf16>
      %153 = vector.shape_cast %152 : vector<1x16x128xbf16> to vector<16x128xbf16>
      %154 = arith.extf %153 : vector<16x128xbf16> to vector<16x128xf32>
      %c0_66 = arith.constant 0 : index
      %c0_67 = arith.constant 0 : index
      %155 = vector.load %arg3[%c0_66, %c0_67] : memref<1x128xf32, #tpu.memory_space<vmem>>, vector<1x128xf32>
      %156 = vector.shape_cast %155 : vector<1x128xf32> to vector<128xf32>
      %c0_68 = arith.constant 0 : index
      %c0_69 = arith.constant 0 : index
      %157 = vector.load %arg4[%c0_68, %c0_69] : memref<1x128xf32, #tpu.memory_space<vmem>>, vector<1x128xf32>
      %158 = vector.shape_cast %157 : vector<1x128xf32> to vector<128xf32>
      %cst_70 = arith.constant dense<0.000000e+00> : vector<16xf32>
      %159 = vector.multi_reduction <add>, %154, %cst_70 [1] : vector<16x128xf32> to vector<16xf32>
      %160 = vector.shape_cast %159 : vector<16xf32> to vector<16x1xf32>
      %cst_71 = arith.constant 1.280000e+02 : f32
      %161 = vector.broadcast %cst_71 : f32 to vector<16x1xf32>
      %162 = arith.divf %160, %161 : vector<16x1xf32>
      %163 = vector.broadcast %162 : vector<16x1xf32> to vector<16x128xf32>
      %164 = arith.subf %154, %163 : vector<16x128xf32>
      %165 = arith.mulf %164, %164 : vector<16x128xf32>
      %cst_72 = arith.constant dense<0.000000e+00> : vector<16xf32>
      %166 = vector.multi_reduction <add>, %165, %cst_72 [1] : vector<16x128xf32> to vector<16xf32>
      %167 = vector.shape_cast %166 : vector<16xf32> to vector<16x1xf32>
      %cst_73 = arith.constant 1.280000e+02 : f32
      %168 = vector.broadcast %cst_73 : f32 to vector<16x1xf32>
      %169 = arith.divf %167, %168 : vector<16x1xf32>
      %170 = vector.broadcast %162 : vector<16x1xf32> to vector<16x128xf32>
      %171 = arith.subf %154, %170 : vector<16x128xf32>
      %cst_74 = arith.constant 9.99999974E-6 : f32
      %172 = vector.broadcast %cst_74 : f32 to vector<16x1xf32>
      %173 = arith.addf %169, %172 : vector<16x1xf32>
      %174 = math.rsqrt %173 : vector<16x1xf32>
      %175 = vector.broadcast %174 : vector<16x1xf32> to vector<16x128xf32>
      %176 = arith.mulf %171, %175 : vector<16x128xf32>
      %177 = vector.shape_cast %156 : vector<128xf32> to vector<1x128xf32>
      %178 = vector.broadcast %177 : vector<1x128xf32> to vector<16x128xf32>
      %179 = arith.mulf %176, %178 : vector<16x128xf32>
      %180 = vector.shape_cast %158 : vector<128xf32> to vector<1x128xf32>
      %181 = vector.broadcast %180 : vector<1x128xf32> to vector<16x128xf32>
      %182 = arith.addf %179, %181 : vector<16x128xf32>
      %c0_75 = arith.constant 0 : index
      %c0_76 = arith.constant 0 : index
      %183 = vector.load %arg16[%c0_75, %c0_76] : memref<16x128xf32, #tpu.memory_space<vmem>>, vector<16x128xf32>
      tpu.vector_store %arg16[%c0_75, %c0_76], %182 {strides = array<i32>} : memref<16x128xf32, #tpu.memory_space<vmem>>, vector<16x128xf32>,
      %184 = arith.truncf %182 : vector<16x128xf32> to vector<16x128xbf16>
      %c0_77 = arith.constant 0 : index
      %c0_78 = arith.constant 0 : index
      %185 = vector.load %arg6[%c0_77, %c0_78] : memref<128x256xbf16, #tpu.memory_space<vmem>>, vector<128x256xbf16>
      %cst_79 = arith.constant dense<0.000000e+00> : vector<16x256xf32>
      %186 = tpu.matmul %184, %185, %cst_79 {dimension_numbers = #tpu.dot_dimension_numbers<[1], [0], [0], [1], [0, 0, 1, 1], [], []>} : vector<16x128xbf16>, vector<128x256xbf16>, vector<16x256xf32> -> vector<16x256xf32>
      %187 = vector.extract_strided_slice %186 {offsets = [0, 0], sizes = [16, 128], strides = [1, 1]} : vector<16x256xf32> to vector<16x128xf32>
      %188 = arith.truncf %187 : vector<16x128xf32> to vector<16x128xbf16>
      %c0_80 = arith.constant 0 : index
      %c0_81 = arith.constant 0 : index
      %189 = vector.load %arg17[%c0_80, %c0_81] : memref<16x128xbf16, #tpu.memory_space<vmem>>, vector<16x128xbf16>
      tpu.vector_store %arg17[%c0_80, %c0_81], %188 {strides = array<i32>} : memref<16x128xbf16, #tpu.memory_space<vmem>>, vector<16x128xbf16>,
      %190 = vector.extract_strided_slice %186 {offsets = [0, 128], sizes = [16, 128], strides = [1, 1]} : vector<16x256xf32> to vector<16x128xf32>
      %191 = arith.truncf %190 : vector<16x128xf32> to vector<16x128xbf16>
      %c0_82 = arith.constant 0 : index
      %c0_83 = arith.constant 0 : index
      %192 = vector.load %arg18[%c0_82, %c0_83] : memref<16x128xbf16, #tpu.memory_space<vmem>>, vector<16x128xbf16>
      tpu.vector_store %arg18[%c0_82, %c0_83], %191 {strides = array<i32>} : memref<16x128xbf16, #tpu.memory_space<vmem>>, vector<16x128xbf16>,
    } else {
    }
    %c8_i32 = arith.constant 8 : i32
    %3 = arith.muli %arg1, %c8_i32 : i32
    %4 = tpu.assume_multiple %3, 8 : i32
    %5 = arith.index_cast %4 : i32 to index
    %c0 = arith.constant 0 : index
    %6 = vector.load %arg16[%5, %c0] : memref<16x128xf32, #tpu.memory_space<vmem>>, vector<8x128xf32>
    %7 = arith.truncf %6 : vector<8x128xf32> to vector<8x128xbf16>
    %c0_1 = arith.constant 0 : index
    %c0_2 = arith.constant 0 : index
    %8 = vector.load %arg5[%c0_1, %c0_2] : memref<128x128xbf16, #tpu.memory_space<vmem>>, vector<128x128xbf16>
    %cst = arith.constant dense<0.000000e+00> : vector<8x128xf32>
    %9 = tpu.matmul %7, %8, %cst {dimension_numbers = #tpu.dot_dimension_numbers<[1], [0], [0], [1], [0, 0, 1, 1], [], []>} : vector<8x128xbf16>, vector<128x128xbf16>, vector<8x128xf32> -> vector<8x128xf32>
    %10 = tpu.iota {dimensions = array<i32: 0>} : vector<8x16xi32>
    %c8_i32_3 = arith.constant 8 : i32
    %11 = arith.muli %arg1, %c8_i32_3 : i32
    %12 = vector.broadcast %11 : i32 to vector<8x16xi32>
    %13 = arith.addi %10, %12 : vector<8x16xi32>
    %14 = tpu.iota {dimensions = array<i32: 1>} : vector<8x16xi32>
    %15 = arith.cmpi sle, %14, %13 : vector<8x16xi32>
    %cst_4 = arith.constant 0.000000e+00 : f32
    %cst_5 = arith.constant -1.000000e+30 : f32
    %16 = vector.broadcast %cst_4 : f32 to vector<8x16xf32>
    %17 = vector.broadcast %cst_5 : f32 to vector<8x16xf32>
    %18 = arith.select %15, %16, %17 : vector<8x16xi1>, vector<8x16xf32>
    %19 = vector.extract_strided_slice %9 {offsets = [0, 0], sizes = [8, 32], strides = [1, 1]} : vector<8x128xf32> to vector<8x32xf32>
    %20 = arith.truncf %19 : vector<8x32xf32> to vector<8x32xbf16>
    %c0_6 = arith.constant 0 : index
    %c0_7 = arith.constant 0 : index
    %21 = vector.load %arg17[%c0_6, %c0_7] : memref<16x128xbf16, #tpu.memory_space<vmem>>, vector<16x32xbf16>
    %c0_8 = arith.constant 0 : index
    %c0_9 = arith.constant 0 : index
    %22 = vector.load %arg18[%c0_8, %c0_9] : memref<16x128xbf16, #tpu.memory_space<vmem>>, vector<16x32xbf16>
    %cst_10 = arith.constant dense<0.000000e+00> : vector<8x16xf32>
    %23 = tpu.matmul %20, %21, %cst_10 {dimension_numbers = #tpu.dot_dimension_numbers<[1], [1], [0], [0], [0, 0, 1, 0], [], []>} : vector<8x32xbf16>, vector<16x32xbf16>, vector<8x16xf32> -> vector<8x16xf32>
    %24 = arith.addf %23, %18 : vector<8x16xf32>
    %cst_11 = arith.constant dense<0xFF800000> : vector<8xf32>
    %25 = vector.multi_reduction <maximumf>, %24, %cst_11 [1] : vector<8x16xf32> to vector<8xf32>
    %26 = vector.shape_cast %25 : vector<8xf32> to vector<8x1xf32>
    %27 = vector.broadcast %26 : vector<8x1xf32> to vector<8x16xf32>
    %28 = arith.subf %24, %27 : vector<8x16xf32>
    %29 = math.exp %28 : vector<8x16xf32>
    %cst_12 = arith.constant dense<0.000000e+00> : vector<8xf32>
    %30 = vector.multi_reduction <add>, %29, %cst_12 [1] : vector<8x16xf32> to vector<8xf32>
    %31 = vector.shape_cast %30 : vector<8xf32> to vector<8x1xf32>
    %32 = tpu.reciprocal %31 {approx = true} : vector<8x1xf32> -> vector<8x1xf32>
    %33 = vector.broadcast %32 : vector<8x1xf32> to vector<8x16xf32>
    %34 = arith.mulf %29, %33 : vector<8x16xf32>
    %35 = arith.truncf %34 : vector<8x16xf32> to vector<8x16xbf16>
    %cst_13 = arith.constant dense<0.000000e+00> : vector<8x32xf32>
    %36 = tpu.matmul %35, %22, %cst_13 {dimension_numbers = #tpu.dot_dimension_numbers<[1], [0], [0], [1], [0, 0, 1, 1], [], []>} : vector<8x16xbf16>, vector<16x32xbf16>, vector<8x32xf32> -> vector<8x32xf32>
    %37 = vector.extract_strided_slice %9 {offsets = [0, 32], sizes = [8, 32], strides = [1, 1]} : vector<8x128xf32> to vector<8x32xf32>
    %38 = arith.truncf %37 : vector<8x32xf32> to vector<8x32xbf16>
    %c0_14 = arith.constant 0 : index
    %c32 = arith.constant 32 : index
    %39 = vector.load %arg17[%c0_14, %c32] : memref<16x128xbf16, #tpu.memory_space<vmem>>, vector<16x32xbf16>
    %c0_15 = arith.constant 0 : index
    %c32_16 = arith.constant 32 : index
    %40 = vector.load %arg18[%c0_15, %c32_16] : memref<16x128xbf16, #tpu.memory_space<vmem>>, vector<16x32xbf16>
    %cst_17 = arith.constant dense<0.000000e+00> : vector<8x16xf32>
    %41 = tpu.matmul %38, %39, %cst_17 {dimension_numbers = #tpu.dot_dimension_numbers<[1], [1], [0], [0], [0, 0, 1, 0], [], []>} : vector<8x32xbf16>, vector<16x32xbf16>, vector<8x16xf32> -> vector<8x16xf32>
    %42 = arith.addf %41, %18 : vector<8x16xf32>
    %cst_18 = arith.constant dense<0xFF800000> : vector<8xf32>
    %43 = vector.multi_reduction <maximumf>, %42, %cst_18 [1] : vector<8x16xf32> to vector<8xf32>
    %44 = vector.shape_cast %43 : vector<8xf32> to vector<8x1xf32>
    %45 = vector.broadcast %44 : vector<8x1xf32> to vector<8x16xf32>
    %46 = arith.subf %42, %45 : vector<8x16xf32>
    %47 = math.exp %46 : vector<8x16xf32>
    %cst_19 = arith.constant dense<0.000000e+00> : vector<8xf32>
    %48 = vector.multi_reduction <add>, %47, %cst_19 [1] : vector<8x16xf32> to vector<8xf32>
    %49 = vector.shape_cast %48 : vector<8xf32> to vector<8x1xf32>
    %50 = tpu.reciprocal %49 {approx = true} : vector<8x1xf32> -> vector<8x1xf32>
    %51 = vector.broadcast %50 : vector<8x1xf32> to vector<8x16xf32>
    %52 = arith.mulf %47, %51 : vector<8x16xf32>
    %53 = arith.truncf %52 : vector<8x16xf32> to vector<8x16xbf16>
    %cst_20 = arith.constant dense<0.000000e+00> : vector<8x32xf32>
    %54 = tpu.matmul %53, %40, %cst_20 {dimension_numbers = #tpu.dot_dimension_numbers<[1], [0], [0], [1], [0, 0, 1, 1], [], []>} : vector<8x16xbf16>, vector<16x32xbf16>, vector<8x32xf32> -> vector<8x32xf32>
    %55 = vector.extract_strided_slice %9 {offsets = [0, 64], sizes = [8, 32], strides = [1, 1]} : vector<8x128xf32> to vector<8x32xf32>
    %56 = arith.truncf %55 : vector<8x32xf32> to vector<8x32xbf16>
    %c0_21 = arith.constant 0 : index
    %c64 = arith.constant 64 : index
    %57 = vector.load %arg17[%c0_21, %c64] : memref<16x128xbf16, #tpu.memory_space<vmem>>, vector<16x32xbf16>
    %c0_22 = arith.constant 0 : index
    %c64_23 = arith.constant 64 : index
    %58 = vector.load %arg18[%c0_22, %c64_23] : memref<16x128xbf16, #tpu.memory_space<vmem>>, vector<16x32xbf16>
    %cst_24 = arith.constant dense<0.000000e+00> : vector<8x16xf32>
    %59 = tpu.matmul %56, %57, %cst_24 {dimension_numbers = #tpu.dot_dimension_numbers<[1], [1], [0], [0], [0, 0, 1, 0], [], []>} : vector<8x32xbf16>, vector<16x32xbf16>, vector<8x16xf32> -> vector<8x16xf32>
    %60 = arith.addf %59, %18 : vector<8x16xf32>
    %cst_25 = arith.constant dense<0xFF800000> : vector<8xf32>
    %61 = vector.multi_reduction <maximumf>, %60, %cst_25 [1] : vector<8x16xf32> to vector<8xf32>
    %62 = vector.shape_cast %61 : vector<8xf32> to vector<8x1xf32>
    %63 = vector.broadcast %62 : vector<8x1xf32> to vector<8x16xf32>
    %64 = arith.subf %60, %63 : vector<8x16xf32>
    %65 = math.exp %64 : vector<8x16xf32>
    %cst_26 = arith.constant dense<0.000000e+00> : vector<8xf32>
    %66 = vector.multi_reduction <add>, %65, %cst_26 [1] : vector<8x16xf32> to vector<8xf32>
    %67 = vector.shape_cast %66 : vector<8xf32> to vector<8x1xf32>
    %68 = tpu.reciprocal %67 {approx = true} : vector<8x1xf32> -> vector<8x1xf32>
    %69 = vector.broadcast %68 : vector<8x1xf32> to vector<8x16xf32>
    %70 = arith.mulf %65, %69 : vector<8x16xf32>
    %71 = arith.truncf %70 : vector<8x16xf32> to vector<8x16xbf16>
    %cst_27 = arith.constant dense<0.000000e+00> : vector<8x32xf32>
    %72 = tpu.matmul %71, %58, %cst_27 {dimension_numbers = #tpu.dot_dimension_numbers<[1], [0], [0], [1], [0, 0, 1, 1], [], []>} : vector<8x16xbf16>, vector<16x32xbf16>, vector<8x32xf32> -> vector<8x32xf32>
    %73 = vector.extract_strided_slice %9 {offsets = [0, 96], sizes = [8, 32], strides = [1, 1]} : vector<8x128xf32> to vector<8x32xf32>
    %74 = arith.truncf %73 : vector<8x32xf32> to vector<8x32xbf16>
    %c0_28 = arith.constant 0 : index
    %c96 = arith.constant 96 : index
    %75 = vector.load %arg17[%c0_28, %c96] : memref<16x128xbf16, #tpu.memory_space<vmem>>, vector<16x32xbf16>
    %c0_29 = arith.constant 0 : index
    %c96_30 = arith.constant 96 : index
    %76 = vector.load %arg18[%c0_29, %c96_30] : memref<16x128xbf16, #tpu.memory_space<vmem>>, vector<16x32xbf16>
    %cst_31 = arith.constant dense<0.000000e+00> : vector<8x16xf32>
    %77 = tpu.matmul %74, %75, %cst_31 {dimension_numbers = #tpu.dot_dimension_numbers<[1], [1], [0], [0], [0, 0, 1, 0], [], []>} : vector<8x32xbf16>, vector<16x32xbf16>, vector<8x16xf32> -> vector<8x16xf32>
    %78 = arith.addf %77, %18 : vector<8x16xf32>
    %cst_32 = arith.constant dense<0xFF800000> : vector<8xf32>
    %79 = vector.multi_reduction <maximumf>, %78, %cst_32 [1] : vector<8x16xf32> to vector<8xf32>
    %80 = vector.shape_cast %79 : vector<8xf32> to vector<8x1xf32>
    %81 = vector.broadcast %80 : vector<8x1xf32> to vector<8x16xf32>
    %82 = arith.subf %78, %81 : vector<8x16xf32>
    %83 = math.exp %82 : vector<8x16xf32>
    %cst_33 = arith.constant dense<0.000000e+00> : vector<8xf32>
    %84 = vector.multi_reduction <add>, %83, %cst_33 [1] : vector<8x16xf32> to vector<8xf32>
    %85 = vector.shape_cast %84 : vector<8xf32> to vector<8x1xf32>
    %86 = tpu.reciprocal %85 {approx = true} : vector<8x1xf32> -> vector<8x1xf32>
    %87 = vector.broadcast %86 : vector<8x1xf32> to vector<8x16xf32>
    %88 = arith.mulf %83, %87 : vector<8x16xf32>
    %89 = arith.truncf %88 : vector<8x16xf32> to vector<8x16xbf16>
    %cst_34 = arith.constant dense<0.000000e+00> : vector<8x32xf32>
    %90 = tpu.matmul %89, %76, %cst_34 {dimension_numbers = #tpu.dot_dimension_numbers<[1], [0], [0], [1], [0, 0, 1, 1], [], []>} : vector<8x16xbf16>, vector<16x32xbf16>, vector<8x32xf32> -> vector<8x32xf32>
    %91 = tpu.concatenate %36, %54, %72, %90 in 1 : vector<8x32xf32>, vector<8x32xf32>, vector<8x32xf32>, vector<8x32xf32> -> vector<8x128xf32>
    %92 = arith.truncf %91 : vector<8x128xf32> to vector<8x128xbf16>
    %c0_35 = arith.constant 0 : index
    %c0_36 = arith.constant 0 : index
    %93 = vector.load %arg7[%c0_35, %c0_36] : memref<128x128xbf16, #tpu.memory_space<vmem>>, vector<128x128xbf16>
    %cst_37 = arith.constant dense<0.000000e+00> : vector<8x128xf32>
    %94 = tpu.matmul %92, %93, %cst_37 {dimension_numbers = #tpu.dot_dimension_numbers<[1], [0], [0], [1], [0, 0, 1, 1], [], []>} : vector<8x128xbf16>, vector<128x128xbf16>, vector<8x128xf32> -> vector<8x128xf32>
    %c0_38 = arith.constant 0 : index
    %c0_39 = arith.constant 0 : index
    %95 = vector.load %arg8[%c0_38, %c0_39] : memref<1x128xf32, #tpu.memory_space<vmem>>, vector<1x128xf32>
    %96 = vector.shape_cast %95 : vector<1x128xf32> to vector<128xf32>
    %97 = vector.shape_cast %96 : vector<128xf32> to vector<1x128xf32>
    %98 = vector.broadcast %97 : vector<1x128xf32> to vector<8x128xf32>
    %99 = arith.addf %94, %98 : vector<8x128xf32>
    %100 = arith.addf %6, %99 : vector<8x128xf32>
    %c0_40 = arith.constant 0 : index
    %c0_41 = arith.constant 0 : index
    %101 = vector.load %arg9[%c0_40, %c0_41] : memref<1x128xf32, #tpu.memory_space<vmem>>, vector<1x128xf32>
    %102 = vector.shape_cast %101 : vector<1x128xf32> to vector<128xf32>
    %c0_42 = arith.constant 0 : index
    %c0_43 = arith.constant 0 : index
    %103 = vector.load %arg10[%c0_42, %c0_43] : memref<1x128xf32, #tpu.memory_space<vmem>>, vector<1x128xf32>
    %104 = vector.shape_cast %103 : vector<1x128xf32> to vector<128xf32>
    %cst_44 = arith.constant dense<0.000000e+00> : vector<8xf32>
    %105 = vector.multi_reduction <add>, %100, %cst_44 [1] : vector<8x128xf32> to vector<8xf32>
    %106 = vector.shape_cast %105 : vector<8xf32> to vector<8x1xf32>
    %cst_45 = arith.constant 1.280000e+02 : f32
    %107 = vector.broadcast %cst_45 : f32 to vector<8x1xf32>
    %108 = arith.divf %106, %107 : vector<8x1xf32>
    %109 = vector.broadcast %108 : vector<8x1xf32> to vector<8x128xf32>
    %110 = arith.subf %100, %109 : vector<8x128xf32>
    %111 = arith.mulf %110, %110 : vector<8x128xf32>
    %cst_46 = arith.constant dense<0.000000e+00> : vector<8xf32>
    %112 = vector.multi_reduction <add>, %111, %cst_46 [1] : vector<8x128xf32> to vector<8xf32>
    %113 = vector.shape_cast %112 : vector<8xf32> to vector<8x1xf32>
    %cst_47 = arith.constant 1.280000e+02 : f32
    %114 = vector.broadcast %cst_47 : f32 to vector<8x1xf32>
    %115 = arith.divf %113, %114 : vector<8x1xf32>
    %116 = vector.broadcast %108 : vector<8x1xf32> to vector<8x128xf32>
    %117 = arith.subf %100, %116 : vector<8x128xf32>
    %cst_48 = arith.constant 9.99999974E-6 : f32
    %118 = vector.broadcast %cst_48 : f32 to vector<8x1xf32>
    %119 = arith.addf %115, %118 : vector<8x1xf32>
    %120 = math.rsqrt %119 : vector<8x1xf32>
    %121 = vector.broadcast %120 : vector<8x1xf32> to vector<8x128xf32>
    %122 = arith.mulf %117, %121 : vector<8x128xf32>
    %123 = vector.shape_cast %102 : vector<128xf32> to vector<1x128xf32>
    %124 = vector.broadcast %123 : vector<1x128xf32> to vector<8x128xf32>
    %125 = arith.mulf %122, %124 : vector<8x128xf32>
    %126 = vector.shape_cast %104 : vector<128xf32> to vector<1x128xf32>
    %127 = vector.broadcast %126 : vector<1x128xf32> to vector<8x128xf32>
    %128 = arith.addf %125, %127 : vector<8x128xf32>
    %129 = arith.truncf %128 : vector<8x128xf32> to vector<8x128xbf16>
    %c0_49 = arith.constant 0 : index
    %c0_50 = arith.constant 0 : index
    %130 = vector.load %arg11[%c0_49, %c0_50] : memref<128x512xbf16, #tpu.memory_space<vmem>>, vector<128x512xbf16>
    %cst_51 = arith.constant dense<0.000000e+00> : vector<8x512xf32>
    %131 = tpu.matmul %129, %130, %cst_51 {dimension_numbers = #tpu.dot_dimension_numbers<[1], [0], [0], [1], [0, 0, 1, 1], [], []>} : vector<8x128xbf16>, vector<128x512xbf16>, vector<8x512xf32> -> vector<8x512xf32>
    %c0_52 = arith.constant 0 : index
    %c0_53 = arith.constant 0 : index
    %132 = vector.load %arg12[%c0_52, %c0_53] : memref<1x512xf32, #tpu.memory_space<vmem>>, vector<1x512xf32>
    %133 = vector.shape_cast %132 : vector<1x512xf32> to vector<512xf32>
    %134 = vector.shape_cast %133 : vector<512xf32> to vector<1x512xf32>
    %135 = vector.broadcast %134 : vector<1x512xf32> to vector<8x512xf32>
    %136 = arith.addf %131, %135 : vector<8x512xf32>
    %cst_54 = arith.constant 0.000000e+00 : f32
    %137 = vector.broadcast %cst_54 : f32 to vector<8x512xf32>
    %138 = arith.maximumf %136, %137 : vector<8x512xf32>
    %139 = arith.truncf %138 : vector<8x512xf32> to vector<8x512xbf16>
    %c0_55 = arith.constant 0 : index
    %c0_56 = arith.constant 0 : index
    %140 = vector.load %arg13[%c0_55, %c0_56] : memref<512x128xbf16, #tpu.memory_space<vmem>>, vector<512x128xbf16>
    %cst_57 = arith.constant dense<0.000000e+00> : vector<8x128xf32>
    %141 = tpu.matmul %139, %140, %cst_57 {dimension_numbers = #tpu.dot_dimension_numbers<[1], [0], [0], [1], [0, 0, 1, 1], [], []>} : vector<8x512xbf16>, vector<512x128xbf16>, vector<8x128xf32> -> vector<8x128xf32>
    %c0_58 = arith.constant 0 : index
    %c0_59 = arith.constant 0 : index
    %142 = vector.load %arg14[%c0_58, %c0_59] : memref<1x128xf32, #tpu.memory_space<vmem>>, vector<1x128xf32>
    %143 = vector.shape_cast %142 : vector<1x128xf32> to vector<128xf32>
    %144 = vector.shape_cast %143 : vector<128xf32> to vector<1x128xf32>
    %145 = vector.broadcast %144 : vector<1x128xf32> to vector<8x128xf32>
    %146 = arith.addf %141, %145 : vector<8x128xf32>
    %147 = arith.addf %128, %146 : vector<8x128xf32>
    %148 = arith.truncf %147 : vector<8x128xf32> to vector<8x128xbf16>
    %c0_60 = arith.constant 0 : index
    %c0_61 = arith.constant 0 : index
    %c0_62 = arith.constant 0 : index
    %149 = vector.load %arg15[%c0_60, %c0_61, %c0_62] : memref<1x8x128xbf16, #tpu.memory_space<vmem>>, vector<1x8x128xbf16>
    %150 = vector.shape_cast %149 : vector<1x8x128xbf16> to vector<8x128xbf16>
    %151 = vector.shape_cast %148 : vector<8x128xbf16> to vector<1x8x128xbf16>
    tpu.vector_store %arg15[%c0_60, %c0_61, %c0_62], %151 {strides = array<i32>} : memref<1x8x128xbf16, #tpu.memory_space<vmem>>, vector<1x8x128xbf16>,
    return
  }
  func.func @transform_0(%arg0: i32, %arg1: i32) -> (i32, i32, i32) {
    %c0_i32 = arith.constant 0 : i32
    %c0_i32_0 = arith.constant 0 : i32
    %c0_i32_1 = arith.constant 0 : i32
    return %arg0, %c0_i32, %c0_i32_0 : i32, i32, i32
  }
  func.func @transform_1(%arg0: i32, %arg1: i32) -> (i32, i32) {
    %c0_i32 = arith.constant 0 : i32
    %c0_i32_0 = arith.constant 0 : i32
    %c0_i32_1 = arith.constant 0 : i32
    return %c0_i32, %c0_i32_0 : i32, i32
  }
  func.func @transform_2(%arg0: i32, %arg1: i32) -> (i32, i32) {
    %c0_i32 = arith.constant 0 : i32
    %c0_i32_0 = arith.constant 0 : i32
    %c0_i32_1 = arith.constant 0 : i32
    return %c0_i32, %c0_i32_0 : i32, i32
  }
  func.func @transform_3(%arg0: i32, %arg1: i32) -> (i32, i32) {
    %c0_i32 = arith.constant 0 : i32
    %c0_i32_0 = arith.constant 0 : i32
    %c0_i32_1 = arith.constant 0 : i32
    return %c0_i32, %c0_i32_0 : i32, i32
  }
  func.func @transform_4(%arg0: i32, %arg1: i32) -> (i32, i32) {
    %c0_i32 = arith.constant 0 : i32
    %c0_i32_0 = arith.constant 0 : i32
    %c0_i32_1 = arith.constant 0 : i32
    return %c0_i32, %c0_i32_0 : i32, i32
  }
  func.func @transform_5(%arg0: i32, %arg1: i32) -> (i32, i32) {
    %c0_i32 = arith.constant 0 : i32
    %c0_i32_0 = arith.constant 0 : i32
    %c0_i32_1 = arith.constant 0 : i32
    return %c0_i32, %c0_i32_0 : i32, i32
  }
  func.func @transform_6(%arg0: i32, %arg1: i32) -> (i32, i32) {
    %c0_i32 = arith.constant 0 : i32
    %c0_i32_0 = arith.constant 0 : i32
    %c0_i32_1 = arith.constant 0 : i32
    return %c0_i32, %c0_i32_0 : i32, i32
  }
  func.func @transform_7(%arg0: i32, %arg1: i32) -> (i32, i32) {
    %c0_i32 = arith.constant 0 : i32
    %c0_i32_0 = arith.constant 0 : i32
    %c0_i32_1 = arith.constant 0 : i32
    return %c0_i32, %c0_i32_0 : i32, i32
  }
  func.func @transform_8(%arg0: i32, %arg1: i32) -> (i32, i32) {
    %c0_i32 = arith.constant 0 : i32
    %c0_i32_0 = arith.constant 0 : i32
    %c0_i32_1 = arith.constant 0 : i32
    return %c0_i32, %c0_i32_0 : i32, i32
  }
  func.func @transform_9(%arg0: i32, %arg1: i32) -> (i32, i32) {
    %c0_i32 = arith.constant 0 : i32
    %c0_i32_0 = arith.constant 0 : i32
    %c0_i32_1 = arith.constant 0 : i32
    return %c0_i32, %c0_i32_0 : i32, i32
  }
  func.func @transform_10(%arg0: i32, %arg1: i32) -> (i32, i32) {
    %c0_i32 = arith.constant 0 : i32
    %c0_i32_0 = arith.constant 0 : i32
    %c0_i32_1 = arith.constant 0 : i32
    return %c0_i32, %c0_i32_0 : i32, i32
  }
  func.func @transform_11(%arg0: i32, %arg1: i32) -> (i32, i32) {
    %c0_i32 = arith.constant 0 : i32
    %c0_i32_0 = arith.constant 0 : i32
    %c0_i32_1 = arith.constant 0 : i32
    return %c0_i32, %c0_i32_0 : i32, i32
  }
  func.func @transform_12(%arg0: i32, %arg1: i32) -> (i32, i32) {
    %c0_i32 = arith.constant 0 : i32
    %c0_i32_0 = arith.constant 0 : i32
    %c0_i32_1 = arith.constant 0 : i32
    return %c0_i32, %c0_i32_0 : i32, i32
  }
  func.func @transform_13(%arg0: i32, %arg1: i32) -> (i32, i32, i32) {
    %c0_i32 = arith.constant 0 : i32
    %c0_i32_0 = arith.constant 0 : i32
    return %arg0, %arg1, %c0_i32 : i32, i32, i32
  }
}

</mosaic_0001>

<bundles_post_ra>
// kernel: tpu_custom_call.1
= control target key start
LH: loop header
LB: loop body
LE: loop exit
PB: predicated region body
PF: predicated region fallthrough
CT: control target
= control target key end

     0   :  { %s4373_s0 = inlined_call_operand.hbm [shape: bf16[2,16,128], index: 0, kind: input, shape index: {}]   ;;  %s4374_s1 = inlined_call_operand.hbm [shape: f32[1,128], index: 1, kind: input, shape index: {}]   ;;  %s4375_s2 = inlined_call_operand.hbm [shape: f32[1,128], index: 2, kind: input, shape index: {}]   ;;  %s4376_s3 = inlined_call_operand.hbm [shape: bf16[128,128], index: 3, kind: input, shape index: {}]   ;;  %s4377_s4 = inlined_call_operand.hbm [shape: bf16[128,256], index: 4, kind: input, shape index: {}]   ;;  %s4378_s5 = inlined_call_operand.hbm [shape: bf16[128,128], index: 5, kind: input, shape index: {}]   ;;  %s4379_s6 = inlined_call_operand.hbm [shape: f32[1,128], index: 6, kind: input, shape index: {}]   ;;  %s4380_s7 = inlined_call_operand.hbm [shape: f32[1,128], index: 7, kind: input, shape index: {}]   ;;  %s4381_s8 = inlined_call_operand.hbm [shape: f32[1,128], index: 8, kind: input, shape index: {}]   ;;  %s4382_s9 = inlined_call_operand.hbm [shape: bf16[128,512], index: 9, kind: input, shape index: {}]   ;;  %s4383_s10 = inlined_call_operand.hbm [shape: f32[1,512], index: 10, kind: input, shape index: {}]   ;;  %s4384_s11 = inlined_call_operand.hbm [shape: bf16[512,128], index: 11, kind: input, shape index: {}]   ;;  %s4385_s12 = inlined_call_operand.hbm [shape: f32[1,128], index: 12, kind: input, shape index: {}]   ;;  %s4386_s13 = inlined_call_operand.hbm [shape: bf16[2,16,128], index: 13, kind: output, shape index: {}]  }
   0x1   :  { %4406 = sst [smem:[#allocation44_spill]] %s4373_s0 }
   0x2   :  { %4407 = sst [smem:[#allocation45_spill]] %s4374_s1 }
   0x3   :  { %4408 = sst [smem:[#allocation46_spill]] %s4375_s2 }
   0x4   :  { %4409 = sst [smem:[#allocation47_spill]] %s4376_s3 }
   0x5   :  { %4410 = sst [smem:[#allocation48_spill]] %s4377_s4 }
   0x6   :  { %4411 = sst [smem:[#allocation49_spill]] %s4378_s5 }
   0x7   :  { %4412 = sst [smem:[#allocation50_spill]] %s4379_s6 }
   0x8   :  { %4413 = sst [smem:[#allocation51_spill]] %s4380_s7 }
   0x9   :  { %4414 = sst [smem:[#allocation52_spill]] %s4386_s13 }
   0xa   :  { %18 = vsyncpa [#allocation6], 0 }
   0xb   :  { %20 = vsyncpa [#allocation6 + $0x1], 0 }
   0xc   :  { %21 = vsyncpa [#allocation9], 0 }
   0xd   :  { %22 = vsyncpa [#allocation12], 0 }
   0xe   :  { %23 = vsyncpa [#allocation15], 0 }
   0xf   :  { %24 = vsyncpa [#allocation18], 0 }
  0x10   :  { %25 = vsyncpa [#allocation21], 0 }
  0x11   :  { %26 = vsyncpa [#allocation24], 0 }
  0x12   :  { %27 = vsyncpa [#allocation7], 0 }
  0x13   :  { %29 = vsyncpa [#allocation7 + $0x1], 0  ;;  %s3715_s25 = smov 0   ;;  %s3717_s26 = smov 0  }
  0x14   :  { %s3719_s27 = smov 0   ;;  %s3721_s28 = smov 0  }
  0x15   :  { %s3723_s29 = smov 0   ;;  %s3725_s30 = smov 0  }
  0x16   :  { %s3727_s14 = smov 0   ;;  %s3729_s15 = smov 0  }
  0x17   :  { %s3731_s16 = smov 0   ;;  %s3733_s17 = smov 0  }
  0x18   :  { %s3735_s18 = smov 0  }
  0x19 LB: > { %4415 = sst [smem:[#allocation35_spill]] %s3575_s25  ;;  %s4388_s19 = sadd.s32 4294967295, %s3615_s18   ;;  %s3615_s18 = sphi %s3735_s18, %s35_s18   ;;  %s3611_s17 = sphi %s3733_s17, %s4474_s17   ;;  %s3607_s16 = sphi %s3731_s16, %s4473_s16   ;;  %s3603_s15 = sphi %s3729_s15, %s4472_s15   ;;  %s3599_s14 = sphi %s3727_s14, %s4471_s14   ;;  %s3595_s30 = sphi %s3725_s30, %s4470_s30   ;;  %s3591_s29 = sphi %s3723_s29, %s4469_s29   ;;  %s3587_s28 = sphi %s3721_s28, %s4467_s28   ;;  %s3583_s27 = sphi %s3719_s27, %s4468_s27   ;;  %s3579_s26 = sphi %s3717_s26, %s4466_s26   ;;  %s3575_s25 = sphi %s3715_s25, %s4465_s25  }
  0x1a   : > { %4416 = sst [smem:[#allocation36_spill]] %s3579_s26  ;;  %p2404_p0 = scmp.ge.s32.totalorder %s3615_s18, 1 }
  0x1b   : > { %4417 = sst [smem:[#allocation37_spill]] %s3583_s27  ;;  %p3774_p1 = scmp.eq.s32.totalorder %s4388_s19, 0 }
  0x1c   : > { %4418 = sst [smem:[#allocation38_spill]] %s3587_s28  ;;  %p358_p2 = scmp.lt.s32.totalorder %s3615_s18, 5 }
  0x1d   : > { %4419 = sst [smem:[#allocation39_spill]] %s3591_s29  ;;  %s3617_s22 = smov [#allocation8]  }
  0x1e   : > { %4420 = sst [smem:[#allocation40_spill]] %s3599_s14  ;;  %p3779_p3 = pnand %p2404_p0, %p358_p2 }
  0x1f   : > { %4421 = sst [smem:[#allocation41_spill]] %s3603_s15  ;;  %s371_s23 = sshll.u32 %s3617_s22, 4  ;;  %s372_s23 = int_to_ptr.vmem [resolvable:$true] %s371_s23 }
  0x20   : > { %s4422_s20 = scalar_select %p3774_p1, 1, 0 }
  0x21   : > { %s4424_s21 = scalar_select %p3779_p3, 1, 0 }
  0x22   : > { %4423 = sst [smem:[#allocation42_spill]] %s4422_s20  ;;  %p2776_p4 = pneg %p3779_p3 }
  0x23   : > { %4425 = sst [smem:[#allocation43_spill]] %s4424_s21  ;;  %s3618_s24 = smov [#allocation11]  }
  0x24   : > { %s392_s13 = sshll.u32 %s3618_s24, 4  ;;  %p3787_p5 = pnand %p2776_p4, %p3774_p1  ;;  %s3791_s13 = int_to_ptr.vmem [resolvable:$true] %s392_s13 }
  0x25   : > { %s3619_s15 = smov [#allocation14]   ;;  %s4427_s1 = sld [smem:[#allocation45_spill]] }
  0x26   : > { %s3793_s14 = sshll.u32 %s3619_s15, 4  ;;  %p3803_p7 = pneg %p3787_p5  ;;  %s419_s14 = int_to_ptr.vmem [resolvable:$true] %s3793_s14 }
  0x2b   : > { %s3103_s22 = scalar_lea.hbm %s4427_s1, 16 }
  0x2c   : > { %p3104_p6 = scmp.ne.s32.totalorder %s4427_s1, %s3103_s22  ;;  %p3110_p10 = scmp.lt.u32.totalorder %s3103_s22, %s4427_s1 }
  0x2e   : > { %p3106_p8 = pnand %p3803_p7, %p3104_p6 }
  0x30   : > { %p3107_p9 = pneg %p3106_p8 }
  0x32   : > { %p3112_p11 = pnand %p3110_p10, %p3107_p9 }
  0x34   : > { %3115 = shalt.err (!%p3112_p11)
}
  0x35   : > { %s3116_s0 = scalar_lea.vmem %s372_s23, 16  ;;  %s3123_s25 = scalar_lea.vmem %s372_s23, 32 }
  0x36   : > { %p3117_p12 = scmp.ne.s32.totalorder %s372_s23, %s3116_s0  ;;  %p3124_p2 = scmp.lt.s32.totalorder %s372_s23, %s372_s23 }
  0x37   : > { %p3125_p4 = scmp.lt.s32.totalorder %s3123_s25, %s3116_s0 }
  0x38   : > { %p3119_p13 = pnand %p3117_p12, %p3803_p7 }
  0x39   : > { %p3126_p3 = por %p3125_p4, %p3124_p2 }
  0x3a   : > { %p3120_p0 = pneg %p3119_p13 }
  0x3c   : > { %p3127_p1 = pnand %p3126_p3, %p3120_p0 }
  0x3e   : > { %3130 = shalt.err (!%p3127_p1)
}
  0x3f   : > { %2779 = dma.hbm_to_vmem [thread:$0]  (!%p3787_p5), %s4427_s1, 16, %s372_s23, [#allocation9]  }
  0x40   : > { %s4429_s3 = sld [smem:[#allocation47_spill]] }
  0x46   : > { %s3131_s15 = scalar_lea.hbm %s4429_s3, 1024 }
  0x47   : > { %p3132_p6 = scmp.ne.s32.totalorder %s4429_s3, %s3131_s15  ;;  %p3138_p1 = scmp.lt.u32.totalorder %s3131_s15, %s4429_s3 }
  0x49   : > { %p3134_p8 = pnand %p3132_p6, %p3803_p7 }
  0x4b   : > { %p3135_p9 = pneg %p3134_p8 }
  0x4d   : > { %p3140_p3 = pnand %p3138_p1, %p3135_p9 }
  0x4f   : > { %3143 = shalt.err (!%p3140_p3)
}
  0x50   : > { %s3144_s23 = scalar_lea.vmem %s3791_s13, 1024  ;;  %p3152_p13 = scmp.lt.s32.totalorder %s3791_s13, %s3791_s13 }
  0x51   : > { %p3145_p10 = scmp.ne.s32.totalorder %s3791_s13, %s3144_s23  ;;  %p3153_p0 = scmp.lt.s32.totalorder %s3144_s23, %s3144_s23 }
  0x53   : > { %p3147_p11 = pnand %p3145_p10, %p3803_p7  ;;  %p3154_p2 = por %p3153_p0, %p3152_p13 }
  0x55   : > { %p3148_p12 = pneg %p3147_p11 }
  0x57   : > { %p3155_p4 = pnand %p3154_p2, %p3148_p12 }
  0x59   : > { %3158 = shalt.err (!%p3155_p4)
}
  0x5a   : > { %s4401_s28 = smov 64   ;;  %s4403_s20 = smov 4  }
  0x5b   : > { %2785 = dma.hbm_to_vmem [thread:$0]  (!%p3787_p5), %s4429_s3, 1024, %s3791_s13, [#allocation12], %s4401_s28, %s4401_s28, %s4403_s20  }
  0x5c   : > { %s4430_s5 = sld [smem:[#allocation49_spill]] }
  0x62   : > { %s3159_s15 = scalar_lea.hbm %s4430_s5, 1024 }
  0x63   : > { %p3160_p6 = scmp.ne.s32.totalorder %s4430_s5, %s3159_s15  ;;  %p3166_p1 = scmp.lt.u32.totalorder %s3159_s15, %s4430_s5 }
  0x65   : > { %p3162_p8 = pnand %p3160_p6, %p3803_p7 }
  0x67   : > { %p3163_p9 = pneg %p3162_p8 }
  0x69   : > { %p3168_p3 = pnand %p3166_p1, %p3163_p9 }
  0x6b   : > { %3171 = shalt.err (!%p3168_p3)
}
  0x6c   : > { %s3172_s26 = scalar_lea.vmem %s419_s14, 1024  ;;  %p3180_p13 = scmp.lt.s32.totalorder %s419_s14, %s419_s14 }
  0x6d   : > { %p3173_p10 = scmp.ne.s32.totalorder %s419_s14, %s3172_s26  ;;  %p3181_p0 = scmp.lt.s32.totalorder %s3172_s26, %s3172_s26 }
  0x6f   : > { %p3175_p11 = pnand %p3173_p10, %p3803_p7  ;;  %p3182_p2 = por %p3181_p0, %p3180_p13 }
  0x71   : > { %p3176_p12 = pneg %p3175_p11 }
  0x73   : > { %p3183_p4 = pnand %p3182_p2, %p3176_p12 }
  0x75   : > { %3186 = shalt.err (!%p3183_p4)
}
  0x76   : > { %2791 = dma.hbm_to_vmem [thread:$0]  (!%p3787_p5), %s4430_s5, 1024, %s419_s14, [#allocation15], %s4401_s28, %s4401_s28, %s4403_s20  }
  0x77   : > { %s3622_s21 = smov [#allocation17]   ;;  %s3623_s22 = smov [#allocation20]  }
  0x78   : > { %s443_s27 = sshll.u32 %s3622_s21, 4  ;;  %s464_s15 = sshll.u32 %s3623_s22, 4  ;;  %s444_s27 = int_to_ptr.vmem [resolvable:$true] %s443_s27  ;;  %s465_s15 = int_to_ptr.vmem [resolvable:$true] %s464_s15 }
  0x79   : > { %s4431_s7 = sld [smem:[#allocation51_spill]] }
  0x7f   : > { %s3187_s23 = scalar_lea.hbm %s4431_s7, 16 }
  0x80   : > { %p3188_p6 = scmp.ne.s32.totalorder %s4431_s7, %s3187_s23  ;;  %p3194_p1 = scmp.lt.u32.totalorder %s3187_s23, %s4431_s7 }
  0x82   : > { %p3190_p8 = pnand %p3188_p6, %p3803_p7 }
  0x84   : > { %p3191_p9 = pneg %p3190_p8 }
  0x86   : > { %p3196_p3 = pnand %p3194_p1, %p3191_p9 }
  0x88   : > { %3199 = shalt.err (!%p3196_p3)
}
  0x89   : > { %s3200_s14 = scalar_lea.vmem %s444_s27, 16  ;;  %s3207_s13 = scalar_lea.vmem %s444_s27, 32 }
  0x8a   : > { %p3201_p10 = scmp.ne.s32.totalorder %s444_s27, %s3200_s14  ;;  %p3208_p13 = scmp.lt.s32.totalorder %s444_s27, %s444_s27 }
  0x8b   : > { %p3209_p0 = scmp.lt.s32.totalorder %s3207_s13, %s3200_s14 }
  0x8c   : > { %p3203_p11 = pnand %p3201_p10, %p3803_p7 }
  0x8d   : > { %p3210_p2 = por %p3209_p0, %p3208_p13 }
  0x8e   : > { %p3204_p12 = pneg %p3203_p11 }
  0x90   : > { %p3211_p4 = pnand %p3210_p2, %p3204_p12 }
  0x92   : > { %3214 = shalt.err (!%p3211_p4)
}
  0x93   : > { %2797 = dma.hbm_to_vmem [thread:$0]  (!%p3787_p5), %s4431_s7, 16, %s444_s27, [#allocation18]  }
  0x94   : > { %s3215_s0 = scalar_lea.hbm %s4382_s9, 4096 }
  0x95   : > { %p3216_p6 = scmp.ne.s32.totalorder %s4382_s9, %s3215_s0  ;;  %p3222_p1 = scmp.lt.u32.totalorder %s3215_s0, %s4382_s9 }
  0x97   : > { %p3218_p8 = pnand %p3216_p6, %p3803_p7 }
  0x99   : > { %p3219_p9 = pneg %p3218_p8 }
  0x9b   : > { %p3224_p3 = pnand %p3222_p1, %p3219_p9 }
  0x9d   : > { %3227 = shalt.err (!%p3224_p3)
}
  0x9e   : > { %s3228_s14 = scalar_lea.vmem %s465_s15, 4096  ;;  %p3236_p13 = scmp.lt.s32.totalorder %s465_s15, %s465_s15 }
  0x9f   : > { %p3229_p10 = scmp.ne.s32.totalorder %s465_s15, %s3228_s14  ;;  %p3237_p0 = scmp.lt.s32.totalorder %s3228_s14, %s3228_s14 }
  0xa1   : > { %p3231_p11 = pnand %p3229_p10, %p3803_p7  ;;  %p3238_p2 = por %p3237_p0, %p3236_p13 }
  0xa3   : > { %p3232_p12 = pneg %p3231_p11 }
  0xa5   : > { %p3239_p4 = pnand %p3238_p2, %p3232_p12 }
  0xa7   : > { %3242 = shalt.err (!%p3239_p4)
}
  0xa8   : > { %s3624_s27 = smov 256   ;;  %s3625_s13 = smov 16  }
  0xa9   : > { %2803 = dma.hbm_to_vmem [thread:$0]  (!%p3787_p5), %s4382_s9, 4096, %s465_s15, [#allocation21], %s3624_s27, %s3624_s27, %s3625_s13  }
  0xaa   : > { %s3626_s29 = smov [#allocation23]   ;;  %s3627_s0 = smov [#allocation10]  }
  0xab   : > { %s488_s22 = sshll.u32 %s3626_s29, 4  ;;  %s382_s25 = sshll.u32 %s3627_s0, 4  ;;  %s489_s22 = int_to_ptr.vmem [resolvable:$true] %s488_s22  ;;  %s383_s25 = int_to_ptr.vmem [resolvable:$true] %s382_s25 }
  0xac   : > { %s3243_s1 = scalar_lea.hbm %s4384_s11, 4096 }
  0xad   : > { %p3244_p6 = scmp.ne.s32.totalorder %s4384_s11, %s3243_s1  ;;  %p3250_p1 = scmp.lt.u32.totalorder %s3243_s1, %s4384_s11 }
  0xaf   : > { %p3246_p8 = pnand %p3244_p6, %p3803_p7 }
  0xb1   : > { %p3247_p9 = pneg %p3246_p8 }
  0xb3   : > { %p3252_p3 = pnand %p3250_p1, %p3247_p9 }
  0xb5   : > { %3255 = shalt.err (!%p3252_p3)
}
  0xb6   : > { %s3256_s15 = scalar_lea.vmem %s489_s22, 4096  ;;  %p3264_p13 = scmp.lt.s32.totalorder %s489_s22, %s489_s22 }
  0xb7   : > { %p3257_p10 = scmp.ne.s32.totalorder %s489_s22, %s3256_s15  ;;  %p3265_p0 = scmp.lt.s32.totalorder %s3256_s15, %s3256_s15 }
  0xb9   : > { %p3259_p11 = pnand %p3257_p10, %p3803_p7  ;;  %p3266_p2 = por %p3265_p0, %p3264_p13 }
  0xbb   : > { %p3260_p12 = pneg %p3259_p11 }
  0xbd   : > { %p3267_p4 = pnand %p3266_p2, %p3260_p12 }
  0xbf   : > { %3270 = shalt.err (!%p3267_p4)
}
  0xc0   : > { %s4432_s28 = smov 4   ;;  %s4433_s27 = smov 64  }
  0xc1   : > { %2809 = dma.hbm_to_vmem [thread:$0]  (!%p3787_p5), %s4384_s11, 4096, %s489_s22, [#allocation24], %s4433_s27, %s4433_s27, %s4432_s28  }
  0xc2   : > { %s4434_s2 = sld [smem:[#allocation46_spill]] }
  0xc8   : > { %s3271_s21 = scalar_lea.hbm %s4434_s2, 16 }
  0xc9   : > { %p3272_p6 = scmp.ne.s32.totalorder %s4434_s2, %s3271_s21  ;;  %p3278_p1 = scmp.lt.u32.totalorder %s3271_s21, %s4434_s2 }
  0xcb   : > { %p3274_p8 = pnand %p3272_p6, %p3803_p7 }
  0xcd   : > { %p3275_p9 = pneg %p3274_p8 }
  0xcf   : > { %p3280_p3 = pnand %p3278_p1, %p3275_p9 }
  0xd1   : > { %3283 = shalt.err (!%p3280_p3)
}
  0xd2   : > { %s3284_s1 = scalar_lea.vmem %s383_s25, 16  ;;  %s3291_s22 = scalar_lea.vmem %s383_s25, 32 }
  0xd3   : > { %p3285_p10 = scmp.ne.s32.totalorder %s383_s25, %s3284_s1  ;;  %p3292_p13 = scmp.lt.s32.totalorder %s383_s25, %s383_s25 }
  0xd4   : > { %p3293_p0 = scmp.lt.s32.totalorder %s3291_s22, %s3284_s1 }
  0xd5   : > { %p3287_p11 = pnand %p3285_p10, %p3803_p7 }
  0xd6   : > { %p3294_p2 = por %p3293_p0, %p3292_p13 }
  0xd7   : > { %p3288_p12 = pneg %p3287_p11 }
  0xd9   : > { %p3295_p4 = pnand %p3294_p2, %p3288_p12 }
  0xdb   : > { %3298 = shalt.err (!%p3295_p4)
}
  0xdc   : > { %2782 = dma.hbm_to_vmem [thread:$0]  (!%p3787_p5), %s4434_s2, 16, %s383_s25, [#allocation9]  }
  0xdd   : > { %s3628_s5 = smov [#allocation13]   ;;  %s4435_s4 = sld [smem:[#allocation48_spill]] }
  0xde   : > { %s405_s20 = sshll.u32 %s3628_s5, 4  ;;  %s406_s20 = int_to_ptr.vmem [resolvable:$true] %s405_s20 }
  0xe3   : > { %s3299_s21 = scalar_lea.hbm %s4435_s4, 2048 }
  0xe4   : > { %p3300_p6 = scmp.ne.s32.totalorder %s4435_s4, %s3299_s21  ;;  %p3306_p1 = scmp.lt.u32.totalorder %s3299_s21, %s4435_s4 }
  0xe6   : > { %p3302_p8 = pnand %p3300_p6, %p3803_p7 }
  0xe8   : > { %p3303_p9 = pneg %p3302_p8 }
  0xea   : > { %p3308_p3 = pnand %p3306_p1, %p3303_p9 }
  0xec   : > { %3311 = shalt.err (!%p3308_p3)
}
  0xed   : > { %s3312_s25 = scalar_lea.vmem %s406_s20, 2048  ;;  %p3320_p13 = scmp.lt.s32.totalorder %s406_s20, %s406_s20 }
  0xee   : > { %p3313_p10 = scmp.ne.s32.totalorder %s406_s20, %s3312_s25  ;;  %p3321_p0 = scmp.lt.s32.totalorder %s3312_s25, %s3312_s25 }
  0xf0   : > { %p3315_p11 = pnand %p3313_p10, %p3803_p7  ;;  %p3322_p2 = por %p3321_p0, %p3320_p13 }
  0xf2   : > { %p3316_p12 = pneg %p3315_p11 }
  0xf4   : > { %p3323_p4 = pnand %p3322_p2, %p3316_p12 }
  0xf6   : > { %3326 = shalt.err (!%p3323_p4)
}
  0xf7   : > { %s3629_s1 = smov 128   ;;  %s3630_s22 = smov 8  }
  0xf8   : > { %2788 = dma.hbm_to_vmem [thread:$0]  (!%p3787_p5), %s4435_s4, 2048, %s406_s20, [#allocation12], %s3629_s1, %s3629_s1, %s3630_s22  }
  0xf9   : > { %s3631_s5 = smov [#allocation16]   ;;  %s3632_s3 = smov [#allocation19]  }
  0xfa   : > { %s432_s13 = sshll.u32 %s3631_s5, 4  ;;  %s454_s21 = sshll.u32 %s3632_s3, 4  ;;  %s433_s13 = int_to_ptr.vmem [resolvable:$true] %s432_s13  ;;  %s3960_s21 = int_to_ptr.vmem [resolvable:$true] %s454_s21 }
  0xfb   : > { %s4436_s6 = sld [smem:[#allocation50_spill]] }
 0x101   : > { %s3327_s23 = scalar_lea.hbm %s4436_s6, 16 }
 0x102   : > { %p3328_p6 = scmp.ne.s32.totalorder %s4436_s6, %s3327_s23  ;;  %p3334_p1 = scmp.lt.u32.totalorder %s3327_s23, %s4436_s6 }
 0x104   : > { %p3330_p8 = pnand %p3328_p6, %p3803_p7 }
 0x106   : > { %p3331_p9 = pneg %p3330_p8 }
 0x108   : > { %p3336_p3 = pnand %p3334_p1, %p3331_p9 }
 0x10a   : > { %3339 = shalt.err (!%p3336_p3)
}
 0x10b   : > { %s3340_s1 = scalar_lea.vmem %s433_s13, 16  ;;  %s3347_s22 = scalar_lea.vmem %s433_s13, 32 }
 0x10c   : > { %p3341_p10 = scmp.ne.s32.totalorder %s433_s13, %s3340_s1  ;;  %p3348_p13 = scmp.lt.s32.totalorder %s433_s13, %s433_s13 }
 0x10d   : > { %p3349_p0 = scmp.lt.s32.totalorder %s3347_s22, %s3340_s1 }
 0x10e   : > { %p3343_p11 = pnand %p3341_p10, %p3803_p7 }
 0x10f   : > { %p3350_p2 = por %p3349_p0, %p3348_p13 }
 0x110   : > { %p3344_p12 = pneg %p3343_p11 }
 0x112   : > { %p3351_p4 = pnand %p3350_p2, %p3344_p12 }
 0x114   : > { %3354 = shalt.err (!%p3351_p4)
}
 0x115   : > { %2794 = dma.hbm_to_vmem [thread:$0]  (!%p3787_p5), %s4436_s6, 16, %s433_s13, [#allocation15]  }
 0x116   : > { %s3355_s0 = scalar_lea.hbm %s4381_s8, 16 }
 0x117   : > { %p3356_p6 = scmp.ne.s32.totalorder %s4381_s8, %s3355_s0  ;;  %p3362_p1 = scmp.lt.u32.totalorder %s3355_s0, %s4381_s8 }
 0x119   : > { %p3358_p8 = pnand %p3356_p6, %p3803_p7 }
 0x11b   : > { %p3359_p9 = pneg %p3358_p8 }
 0x11d   : > { %p3364_p3 = pnand %p3362_p1, %p3359_p9 }
 0x11f   : > { %3367 = shalt.err (!%p3364_p3)
}
 0x120   : > { %s3368_s13 = scalar_lea.vmem %s3960_s21, 16  ;;  %s3375_s20 = scalar_lea.vmem %s3960_s21, 32 }
 0x121   : > { %p3369_p10 = scmp.ne.s32.totalorder %s3960_s21, %s3368_s13  ;;  %p3376_p13 = scmp.lt.s32.totalorder %s3960_s21, %s3960_s21 }
 0x122   : > { %p3377_p0 = scmp.lt.s32.totalorder %s3375_s20, %s3368_s13 }
 0x123   : > { %p3371_p11 = pnand %p3369_p10, %p3803_p7 }
 0x124   : > { %p3378_p2 = por %p3377_p0, %p3376_p13 }
 0x125   : > { %p3372_p12 = pneg %p3371_p11 }
 0x127   : > { %p3379_p4 = pnand %p3378_p2, %p3372_p12 }
 0x129   : > { %3382 = shalt.err (!%p3379_p4)
}
 0x12a   : > { %2800 = dma.hbm_to_vmem [thread:$0]  (!%p3787_p5), %s4381_s8, 16, %s3960_s21, [#allocation18]  }
 0x12b   : > { %s3633_s15 = smov [#allocation22]   ;;  %s3634_s3 = smov [#allocation25]  }
 0x12c   : > { %s478_s5 = sshll.u32 %s3633_s15, 4  ;;  %s502_s29 = sshll.u32 %s3634_s3, 4  ;;  %s479_s5 = int_to_ptr.vmem [resolvable:$true] %s478_s5  ;;  %s4004_s29 = int_to_ptr.vmem [resolvable:$true] %s502_s29 }
 0x12d   : > { %s3383_s26 = scalar_lea.hbm %s4383_s10, 64 }
 0x12e   : > { %p3384_p6 = scmp.ne.s32.totalorder %s4383_s10, %s3383_s26  ;;  %p3390_p1 = scmp.lt.u32.totalorder %s3383_s26, %s4383_s10 }
 0x130   : > { %p3386_p8 = pnand %p3384_p6, %p3803_p7 }
 0x132   : > { %p3387_p9 = pneg %p3386_p8 }
 0x134   : > { %p3392_p3 = pnand %p3390_p1, %p3387_p9 }
 0x136   : > { %3395 = shalt.err (!%p3392_p3)
}
 0x137   : > { %s3396_s20 = scalar_lea.vmem %s479_s5, 64  ;;  %p3404_p13 = scmp.lt.s32.totalorder %s479_s5, %s479_s5 }
 0x138   : > { %p3397_p10 = scmp.ne.s32.totalorder %s479_s5, %s3396_s20  ;;  %p3405_p0 = scmp.lt.s32.totalorder %s3396_s20, %s3396_s20 }
 0x13a   : > { %p3399_p11 = pnand %p3397_p10, %p3803_p7  ;;  %p3406_p2 = por %p3405_p0, %p3404_p13 }
 0x13c   : > { %p3400_p12 = pneg %p3399_p11 }
 0x13e   : > { %p3407_p4 = pnand %p3406_p2, %p3400_p12 }
 0x140   : > { %3410 = shalt.err (!%p3407_p4)
}
 0x141   : > { %2806 = dma.hbm_to_vmem [thread:$0]  (!%p3787_p5), %s4383_s10, 64, %s479_s5, [#allocation21]  }
 0x142   : > { %s3411_s0 = scalar_lea.hbm %s4385_s12, 16 }
 0x143   : > { %p3412_p6 = scmp.ne.s32.totalorder %s4385_s12, %s3411_s0  ;;  %p3418_p1 = scmp.lt.u32.totalorder %s3411_s0, %s4385_s12 }
 0x145   : > { %p3414_p8 = pnand %p3412_p6, %p3803_p7 }
 0x147   : > { %p3415_p9 = pneg %p3414_p8 }
 0x149   : > { %p3420_p3 = pnand %p3418_p1, %p3415_p9 }
 0x14b   : > { %3423 = shalt.err (!%p3420_p3)
}
 0x14c   : > { %s3424_s5 = scalar_lea.vmem %s4004_s29, 16  ;;  %s3431_s13 = scalar_lea.vmem %s4004_s29, 32 }
 0x14d   : > { %p3425_p10 = scmp.ne.s32.totalorder %s4004_s29, %s3424_s5  ;;  %p3432_p13 = scmp.lt.s32.totalorder %s4004_s29, %s4004_s29 }
 0x14e   : > { %p3433_p0 = scmp.lt.s32.totalorder %s3431_s13, %s3424_s5 }
 0x14f   : > { %p3427_p11 = pnand %p3425_p10, %p3803_p7 }
 0x150   : > { %p3434_p2 = por %p3433_p0, %p3432_p13 }
 0x151   : > { %p3428_p12 = pneg %p3427_p11 }
 0x153   : > { %p3435_p4 = pnand %p3434_p2, %p3428_p12 }
 0x155   : > { %3438 = shalt.err (!%p3435_p4)
}
 0x156   : > { %s4437_s24 = sld [smem:[#allocation39_spill]]  ;;  %s4438_s1 = sld [smem:[#allocation38_spill]] }
 0x157   : > { %s4439_s22 = sld [smem:[#allocation42_spill]]  ;;  %s4440_s15 = sld [smem:[#allocation37_spill]] }
 0x158   : > { %2812 = dma.hbm_to_vmem [thread:$0]  (!%p3787_p5), %s4385_s12, 16, %s4004_s29, [#allocation24]  }
 0x159   : > { %s2403_s3 = sadd.s32 4294967294, %s3615_s18   ;;  %s4441_s19 = sld [smem:[#allocation36_spill]] }
 0x15a   : > { %s44_s0 = sadd.s32 1, %s3607_s16  ;;  %s47_s23 = sadd.s32 1, %s3611_s17 }
 0x15b   : > { %p45_p7 = scmp.ge.s32.totalorder %s44_s0, 2  ;;  %s54_s26 = sadd.s32 1, %s3595_s30 }
 0x15c   : > { %p61_p6 = scmp.ne.s32.totalorder %s3595_s30, %s4437_s24  ;;  %p62_p8 = scmp.eq.s32.totalorder %s3615_s18, 0 }
 0x15d   : > { %s4476_s0 = smov (%p45_p7, %s44_s0), 0  ;;  %s4478_s23 = smov (!%p45_p7, %s47_s23), %s3611_s17 }
 0x15e   : > { %p67_p9 = scmp.ne.s32.totalorder %s4437_s24, %s4438_s1  ;;  %s4442_s29 = sld [smem:[#allocation35_spill]] }
 0x15f   : > { %p49_p5 = scmp.ge.s32.totalorder %s4478_s23, 2  ;;  %s330_s25 = ssub.s32 %s3607_s16, %s4476_s0 }
 0x160   : > { %p4062_p1 = por %p62_p8, %p61_p6  ;;  %p4444_p3 = scmp.ne.s32.totalorder %s4439_s22, 0 }
 0x161   : > { %s4480_s23 = smov (%p49_p5, %s4478_s23), 0  ;;  %s334_s13 = sadd.s32 1, %s4440_s15 }
 0x162   : > { %p4068_p10 = por %p4444_p3, %p67_p9  ;;  %p344_p11 = scmp.ne.s32.totalorder %s4440_s15, %s4441_s19 }
 0x163   : > { %s51_s21 = ssub.s32 %s3611_s17, %s4480_s23  ;;  %s4446_s20 = sadd.s32 4294967295, %s3615_s18  }
 0x164   : > { %p345_p12 = scmp.eq.s32.totalorder %s4446_s20, 3  ;;  %p52_p13 = scmp.eq.s32.totalorder %s51_s21, 0 }
 0x165   : > { %s331_s24 = sor.u32 %s330_s25, %s51_s21  ;;  %p350_p4 = scmp.ne.s32.totalorder %s4441_s19, %s4442_s29 }
 0x166   : > { %p332_p0 = scmp.eq.s32.totalorder %s331_s24, 0  ;;  %p4081_p2 = por %p345_p12, %p344_p11 }
 0x167   : > { %s4086_s22 = scalar_select %p52_p13, %s3595_s30, %s54_s26  }
 0x168   : > { %s4447_s1 = scalar_select %p4081_p2, 1, 0 }
 0x169   : > { %s4482_s15 = smov (!%p332_p0, %s4440_s15), %s334_s13  ;;  %p351_p7 = scmp.eq.s32.totalorder %s2403_s3, 3 }
 0x16a   : > { %p2833_p6 = scmp.lt.s32.totalorder %s3615_s18, 4  ;;  %s513_s2 = sand.u32 1, %s3595_s30  }
 0x16b   : > { %p4095_p8 = por %p351_p7, %p350_p4  ;;  %s2418_s20 = sshll.u32 %s513_s2, 3 }
 0x16c   : > { %s2553_s6 = sshll.u32 %s3611_s17, 7  ;;  %s4449_s24 = sld [smem:[#allocation44_spill]] }
 0x16d   : > { %s4448_s4 = scalar_select %p4095_p8, 1, 0 }
 0x16e   : > { %s517_s26 = scalar_lea.vmem [#allocation5], %s2418_s20  ;;  %p4107_p9 = pnand %p2833_p6, %p4062_p1 }
 0x16f   : > { %s524_s19 = sshll.u32 %s517_s26, 4  ;;  %s4113_s29 = scalar_lea.sflag [#allocation6], %s513_s2  ;;  %s4111_s19 = int_to_ptr.vmem [resolvable:$true] %s524_s19 }
 0x170   : > { %p3441_p3 = pneg %p4107_p9 }
 0x172   : > { %s4103_s7 = scalar_lea.hbm %s4449_s24, %s2553_s6  ;;  %s3444_s20 = scalar_lea.hbm %s4449_s24, 256 }
 0x173   : > { %s3439_s13 = scalar_lea.hbm %s4103_s7, 128  ;;  %p3445_p1 = scmp.lt.u32.totalorder %s4103_s7, %s4449_s24 }
 0x174   : > { %p3440_p5 = scmp.ne.s32.totalorder %s4103_s7, %s3439_s13  ;;  %p3446_p13 = scmp.lt.u32.totalorder %s3444_s20, %s3439_s13 }
 0x175   : > { %p3448_p4 = scmp.lt.u32.totalorder %s3439_s13, %s4103_s7 }
 0x176   : > { %p3442_p11 = pnand %p3441_p3, %p3440_p5  ;;  %p3447_p0 = por %p3446_p13, %p3445_p1 }
 0x178   : > { %p3443_p12 = pneg %p3442_p11  ;;  %p3449_p7 = por %p3448_p4, %p3447_p0 }
 0x17a   : > { %p3450_p6 = pnand %p3449_p7, %p3443_p12 }
 0x17c   : > { %3453 = shalt.err (!%p3450_p6)
}
 0x17d   : > { %s3454_s2 = scalar_lea.vmem %s4111_s19, 128  ;;  %s3635_s26 = smov [#allocation5]  }
 0x17e   : > { %p3455_p5 = scmp.ne.s32.totalorder %s4111_s19, %s3454_s2  ;;  %s3459_s6 = sshll.u32 %s3635_s26, 4  ;;  %s3460_s6 = int_to_ptr.vmem [resolvable:$false] %s3459_s6 }
 0x17f   : > { %s3461_s14 = scalar_lea.vmem %s3460_s6, 256  ;;  %p3462_p2 = scmp.lt.s32.totalorder %s4111_s19, %s3460_s6 }
 0x180   : > { %p3457_p11 = pnand %p3455_p5, %p3441_p3  ;;  %p3463_p1 = scmp.lt.s32.totalorder %s3461_s14, %s3454_s2 }
 0x182   : > { %p3458_p8 = pneg %p3457_p11  ;;  %p3464_p13 = por %p3463_p1, %p3462_p2 }
 0x184   : > { %p3465_p0 = pnand %p3464_p13, %p3458_p8 }
 0x186   : > { %3468 = shalt.err (!%p3465_p0)
}
 0x187   : > { %2816 = dma.hbm_to_vmem [thread:$0]  (!%p4107_p9), %s4103_s7, 128, %s4111_s19, %s4113_s29, %s4433_s27, %s4433_s27, %s4432_s28  }
 0x188   : > { %s4451_s13 = sld [smem:[#allocation43_spill]] }
 0x18e   : > { %p4452_p3 = scmp.ne.s32.totalorder %s4451_s13, 0 }
 0x18f   : > { %s4453_s20 = sld [smem:[#allocation39_spill]] (!%p4452_p3) }
 0x190   : > { %536 = sbr.rel (%p4452_p3) target bundleno = 4680 (0x1248), region = 72 }
 0x195   : > { %s538_s25 = sand.u32 (!%p4452_p3), 1, %s4453_s20  }
 0x196   : > { %s2422_s21 = sshll.u32 (!%p4452_p3), %s538_s25, 3  ;;  %s539_s2 = scalar_lea.sflag (!%p4452_p3), [#allocation6], %s538_s25 }
 0x197   : > { %s542_s26 = scalar_lea.vmem [#allocation5], %s2422_s21 }
 0x198   : > { %3542 = dma.done.wait (%p4068_p10), %s539_s2, 128  }
 0x199   : > { %3544 = vsyncadd (%p4068_p10), %s539_s2, 4294967168  ;;  %s4454_s3 = sld [smem:[#allocation42_spill]] }
 0x19f   : > { %p4455_p2 = scmp.ne.s32.totalorder %s4454_s3, 0 }
 0x1a1   : > { %3546 = dma.done.wait (%p4455_p2), [#allocation9], 32  }
 0x1a2   : > { %3548 = vsyncadd (%p4455_p2), [#allocation9], 4294967264 }
 0x1a3   : > { %3550 = dma.done.wait (%p4455_p2), [#allocation12], 3072  }
 0x1a4   : > { %3552 = vsyncadd (%p4455_p2), [#allocation12], 4294964224 }
 0x1a5   : > { %3554 = dma.done.wait (%p4455_p2), [#allocation15], 1040  }
 0x1a6   : > { %3556 = vsyncadd (%p4455_p2), [#allocation15], 4294966256 }
 0x1a7   : > { %3558 = dma.done.wait (%p4455_p2), [#allocation18], 32  }
 0x1a8   : > { %3560 = vsyncadd (%p4455_p2), [#allocation18], 4294967264 }
 0x1a9   : > { %3562 = dma.done.wait (%p4455_p2), [#allocation21], 4160  }
 0x1aa   : > { %3564 = vsyncadd (%p4455_p2), [#allocation21], 4294963136 }
 0x1ab   : > { %3566 = dma.done.wait (%p4455_p2), [#allocation24], 4112  }
 0x1ac   : > { %3568 = vsyncadd (%p4455_p2), [#allocation24], 4294963184  ;;  %s4456_s7 = sld [smem:[#allocation36_spill]]  ;;  %s4457_s19 = sld [smem:[#allocation40_spill]] }
 0x1b2   : > { %s630_s28 = sand.u32 1, %s4456_s7   ;;  %p2436_p10 = scmp.ne.s32.totalorder %s4457_s19, 0 }
 0x1b3   : > { %s4178_s27 = sshll.u32 %s630_s28, 2  ;;  %v2555_v0 = vld [vmem:[%s542_s26] sm:$0xff] (!%p2436_p10)   ;;  %v2963_v4 = vld [vmem:[#allocation13] ss:$8 sps:$4 sm:$0xff] (!%p2436_p10)   ;;  %v3636_v22 = vmov (!%p2436_p10), 0  }
 0x1b4   : > { %s632_s5 = scalar_lea.vmem [#allocation26], %s4178_s27  ;;  %637 = sbr.rel (%p2436_p10) target bundleno = 973 (0x3cd), region = 128  ;;  %v2556_v1 = vunpack.c.l.bf16 (!%p2436_p10), %v2555_v0  ;;  %v2557_v2 = vunpack.c.h.bf16 (!%p2436_p10), %v2555_v0  ;;  %v2961_v3 = vld [vmem:[#allocation13 + $0x4] ss:$8 sps:$4 sm:$0xff] (!%p2436_p10)   ;;  %v2964_v5 = vld [vmem:[#allocation13 + $0x14] ss:$8 sps:$4 sm:$0xff] (!%p2436_p10)   ;;  %814 = vmatprep.mubr.bf16.mxu0 (!%p2436_p10), %v3636_v22 }
 0x1b5   : > { %782 = vmatprep.subr.bf16.mxu0 (!%p2436_p10), %v2961_v3  ;;  %v2966_v14 = vld [vmem:[#allocation13 + $0x10] ss:$8 sps:$4 sm:$0xff] (!%p2436_p10)   ;;  %v2967_v15 = vld [vmem:[#allocation13 + $0x24] ss:$8 sps:$4 sm:$0xff] (!%p2436_p10)   ;;  %v2969_v16 = vld [vmem:[#allocation13 + $0x20] ss:$8 sps:$4 sm:$0xff] (!%p2436_p10)  }
 0x1b6   : > { %644 = vadd.xlane.f32.xlu0 (!%p2436_p10), %v2556_v1  ;;  %783 = vmatpush1.bf16.msra.mxu0 (!%p2436_p10), %v2963_v4  ;;  %v2970_v17 = vld [vmem:[#allocation13 + $0x34] ss:$8 sps:$4 sm:$0xff] (!%p2436_p10)   ;;  %v2972_v18 = vld [vmem:[#allocation13 + $0x30] ss:$8 sps:$4 sm:$0xff] (!%p2436_p10)   ;;  %v2973_v19 = vld [vmem:[#allocation13 + $0x44] ss:$8 sps:$4 sm:$0xff] (!%p2436_p10)  }
 0x1b7   : > { %784 = vmatprep.subr.bf16.mxu0 (!%p2436_p10), %v2964_v5  ;;  %v2975_v20 = vld [vmem:[#allocation13 + $0x40] ss:$8 sps:$4 sm:$0xff] (!%p2436_p10)   ;;  %v2976_v21 = vld [vmem:[#allocation13 + $0x54] ss:$8 sps:$4 sm:$0xff] (!%p2436_p10)   ;;  %v2978_v23 = vld [vmem:[#allocation13 + $0x50] ss:$8 sps:$4 sm:$0xff] (!%p2436_p10)  }
 0x1b8   : > { %v2979_v24 = vld [vmem:[#allocation13 + $0x64] ss:$8 sps:$4 sm:$0xff] (!%p2436_p10)   ;;  %v2981_v25 = vld [vmem:[#allocation13 + $0x60] ss:$8 sps:$4 sm:$0xff] (!%p2436_p10)   ;;  %v2982_v26 = vld [vmem:[#allocation13 + $0x74] ss:$8 sps:$4 sm:$0xff] (!%p2436_p10)  }
 0x1b9   : > { %v2984_v27 = vld [vmem:[#allocation13 + $0x70] ss:$8 sps:$4 sm:$0xff] (!%p2436_p10)   ;;  %v2437_v35 = vld [vmem:[#allocation8] ss:$0 sm:$0xff] (!%p2436_p10)  ;;  %v2438_v37 = vld [vmem:[#allocation10] ss:$0 sm:$0xff] (!%p2436_p10) }
 0x1ba   : > { %646 = vadd.xlane.f32.xlu0 (!%p2436_p10), %v2557_v2  ;;  %785 = vmatpush1.bf16.msra.mxu0 (!%p2436_p10), %v2966_v14 }
 0x1bb   : > { %786 = vmatprep.subr.bf16.mxu0 %v2967_v15 }
 0x1be   : > { %787 = vmatpush1.bf16.msra.mxu0 %v2969_v16 }
 0x1bf   : > { %788 = vmatprep.subr.bf16.mxu0 %v2970_v17 }
 0x1c2   : > { %789 = vmatpush1.bf16.msra.mxu0 %v2972_v18 }
 0x1c3   : > { %790 = vmatprep.subr.bf16.mxu0 %v2973_v19 }
 0x1c6   : > { %791 = vmatpush1.bf16.msra.mxu0 %v2975_v20 }
 0x1c7   : > { %792 = vmatprep.subr.bf16.mxu0 %v2976_v21 }
 0x1ca   : > { %793 = vmatpush1.bf16.msra.mxu0 %v2978_v23 }
 0x1cb   : > { %794 = vmatprep.subr.bf16.mxu0 %v2979_v24 }
 0x1ce   : > { %795 = vmatpush1.bf16.msra.mxu0 %v2981_v25 }
 0x1cf   : > { %796 = vmatprep.subr.bf16.mxu0 %v2982_v26 }
 0x1d2   : > { %797 = vmatpush1.bf16.msra.mxu0 %v2984_v27 }
 0x243   : > { %v645_v6 = vpop.xlane.xlu0 %644 }
 0x244   : > { %v649_v7 = vmul.f32 0.0078125, %v645_v6 }
 0x246   : > { %v651_v8 = vsub.f32 %v2556_v1, %v649_v7 }
 0x247   : > { %v647_v9 = vpop.xlane.xlu0 %646 }
 0x248   : > { %v650_v10 = vmul.f32 0.0078125, %v647_v9  ;;  %v653_v11 = vmul.f32 %v651_v8, %v651_v8 }
 0x24a   : > { %v652_v12 = vsub.f32 %v2557_v2, %v650_v10  ;;  %655 = vadd.xlane.f32.xlu1 %v653_v11 }
 0x24c   : > { %v654_v13 = vmul.f32 %v652_v12, %v652_v12 }
 0x24e   : > { %657 = vadd.xlane.f32.xlu1 %v654_v13 }
 0x2d7   : > { %v656_v28 = vpop.xlane.xlu1 %655 }
 0x2d8   : > { %v659_v29 = vmul.f32 0.0078125, %v656_v28 }
 0x2da   : > { %v661_v30 = vadd.f32 1e-05, %v659_v29 }
 0x2db   : > { %v658_v31 = vpop.xlane.xlu1 %657 }
 0x2dc   : > { %2985 = vrsqrt.f32 %v661_v30  ;;  %v660_v32 = vmul.f32 0.0078125, %v658_v31 }
 0x2de   : > { %v662_v33 = vadd.f32 1e-05, %v660_v32 }
 0x2e0   : > { %2987 = vrsqrt.f32 %v662_v33 }
 0x2e6   : > { %v2986_v34 = vpop.eup %2985 }
 0x2e7   : > { %v665_v36 = vmul.f32 %v2986_v34, %v651_v8 }
 0x2e9   : > { %v673_v38 = vmul.f32 %v2437_v35, %v665_v36 }
 0x2ea   : > { %v2988_v39 = vpop.eup %2987 }
 0x2eb   : > { %v666_v40 = vmul.f32 %v2988_v39, %v652_v12  ;;  %v681_v41 = vadd.f32 %v2438_v37, %v673_v38 }
 0x2ed   : > { %v674_v42 = vmul.f32 %v2437_v35, %v666_v40  ;;  %683 = vst [vmem:[#allocation2] sm:$0xff] %v681_v41 }
 0x2ef   : > { %v682_v43 = vadd.f32 %v2438_v37, %v674_v42 }
 0x2f1   : > { %684 = vst [vmem:[#allocation2 + $0x8] sm:$0xff] %v682_v43  ;;  %v685_v44 = vpack.c.bf16 %v682_v43, %v681_v41 }
 0x2f3   : > { %815 = vmatmul.mubr.bf16.vlgmr.msra.gmra.mrb[0].mxu0 %v685_v44 }
 0x3c6   : > { %v816_v45 = vpop.f32.mrb[0].mxu0 }
 0x3c7   : > { %v818_v46 = vpop.f32.mrb[1].mxu0 }
 0x3c8   : > { %v820_v47 = vpop.f32.mrb[2].mxu0 }
 0x3c9   : > { %v825_v48 = vpack.c.bf16 %v820_v47, %v816_v45  ;;  %v822_v49 = vpop.f32.mrb[3].mxu0 }
 0x3ca   : > { %v827_v50 = vpack.c.bf16 %v822_v49, %v818_v46 }
 0x3cb   : > { %826 = vst [vmem:[#allocation3] sm:$0xff] %v825_v48 }
 0x3cc   : > { %828 = vst [vmem:[#allocation4] sm:$0xff] %v827_v50 }
 0x3cd PF: > { %v2989_v51 = vld [vmem:[#allocation11] sm:$0xff]   ;;  %v3637_v52 = vmov 0.0   ;;  %v2990_v53 = vld [vmem:[#allocation11 + $0x8] sm:$0xff]   ;;  %vm3638_vm0 = vmmov 0   ;;  %v2991_v54 = vld [vmem:[#allocation11 + $0x10] sm:$0xff]   ;;  %vm948_vm1 = vcmask 261120   ;;  %v937_v5 = vlaneseq }
 0x3ce   : > { %2636 = vmatprep.subr.bf16.mxu0 %v3637_v52  ;;  %2656 = vmatprep.subr.bf16.mxu1 %v3637_v52  ;;  %s4458_s29 = sld [smem:[#allocation40_spill]]  ;;  %v2992_v55 = vld [vmem:[#allocation11 + $0x18] sm:$0xff]   ;;  %s3639_s6 = smov 96   ;;  %v2993_v58 = vld [vmem:[#allocation11 + $0x20] sm:$0xff]   ;;  %v2994_v59 = vld [vmem:[#allocation11 + $0x28] sm:$0xff]   ;;  %vm995_vm3 = vcmask 130048  }
 0x3cf   : > { %2637 = vmatpush3.bf16.msra.mxu0 %v2989_v51  ;;  %2652 = vmatprep.mubr.msk.bf16.mxu0 %vm3638_vm0, %v3637_v52  ;;  %v2995_v60 = vld [vmem:[#allocation11 + $0x30] sm:$0xff]   ;;  %v2996_v61 = vld [vmem:[#allocation11 + $0x38] sm:$0xff]   ;;  %v4218_v6 = vshrl.u32 %v937_v5, 7  ;;  %v942_v9 = vand.u32 127, %v937_v5  ;;  %v3640_v10 = vmov -1e+30  }
 0x3d0   : > { %2638 = vmatprep.subr.bf16.mxu0 %v3637_v52  ;;  %2658 = vmatprep.mubr.msk.bf16.mxu1 %vm3638_vm0, %v3637_v52  ;;  %s3641_s20 = smov 64   ;;  %s3642_s25 = smov 32   ;;  %vm1391_vm4 = vcmask 523264   ;;  %vm1393_vm5 = vcmask 785408  }
 0x3d1   : > { %s4459_s21 = sld [smem:[#allocation41_spill]]  ;;  %s2203_s19 = sshll.u32 %s632_s5, 4  ;;  %s4309_s19 = int_to_ptr.vmem [resolvable:$true] %s2203_s19 }
 0x3d2   : > { %v4190_v56 = vld [vmem:[#allocation3] sm:$0xff]  ;;  %p4462_p9 = scmp.ne.s32.totalorder %s4447_s1, 0 }
 0x3d3   : > { %2639 = vmatpush3.bf16.msra.mxu0 %v2990_v53  ;;  %v953_v57 = vsel %vm948_vm1, %v4190_v56, 0  ;;  %1055 = vrot.lane.b32.xlu1 %v4190_v56, %s3639_s6  ;;  %v4226_v23 = vld [vmem:[#allocation4] sm:$0xff] }
 0x3d4   : > { %2640 = vmatprep.subr.bf16.mxu0 %v3637_v52  ;;  %2657 = vmatpush3.bf16.xpose.msra.mxu1 %v953_v57  ;;  %s2455_s14 = sshll.u32 %s4458_s29, 3 }
 0x3d5   : > { %2662 = vmatprep.subr.bf16.mxu1 %v3637_v52  ;;  %s830_s13 = scalar_lea.vmem [#allocation2], %s2455_s14  ;;  %v939_v7 = vstv %s2455_s14 }
 0x3d6   : > { %v4202_v62 = vld [vmem:[%s830_s13] sm:$0xff]  ;;  %v940_v8 = vadd.s32 %v939_v7, %v4218_v6  ;;  %s4461_s13 = sld [smem:[#allocation52_spill]] }
 0x3d7   : > { %2641 = vmatpush3.bf16.msra.mxu0 %v2991_v54  ;;  %v832_v63 = vpack.c.bf16 %v4202_v62, %v4202_v62  ;;  %s2549_s2 = sshll.u32 %s4459_s21, 1  ;;  %s3644_s21 = smov [#allocation26]  }
 0x3d8   : > { %2642 = vmatprep.subr.bf16.mxu0 %v3637_v52  ;;  %vm943_vm2 = vcmp.le.s32.totalorder %v942_v9, %v940_v8  ;;  %s2199_s3 = sadd.s32 %s4458_s29, %s2549_s2  ;;  %s2188_s29 = scalar_lea.sflag [#allocation7], %s630_s28 }
 0x3d9   : > { %v4221_v11 = vsel %vm943_vm2, 0.0, %v3640_v10  ;;  %s2550_s7 = sshll.u32 %s2199_s3, 6  ;;  %s3473_s2 = sshll.u32 %s3644_s21, 4  ;;  %s3474_s2 = int_to_ptr.vmem [resolvable:$false] %s3473_s2 }
 0x3da   : > { %s3475_s3 = scalar_lea.vmem %s3474_s2, 128  ;;  %p3476_p7 = scmp.lt.s32.totalorder %s4309_s19, %s3474_s2 }
 0x3db   : > { %2643 = vmatpush3.bf16.msra.mxu0 %v2992_v55 }
 0x3dc   : > { %2644 = vmatprep.subr.bf16.mxu0 %v3637_v52 }
 0x3df   : > { %2645 = vmatpush3.bf16.msra.mxu0 %v2993_v58 }
 0x3e0   : > { %2646 = vmatprep.subr.bf16.mxu0 %v3637_v52 }
 0x3e3   : > { %2647 = vmatpush3.bf16.msra.mxu0 %v2994_v59 }
 0x3e4   : > { %2648 = vmatprep.subr.bf16.mxu0 %v3637_v52 }
 0x3e7   : > { %2649 = vmatpush3.bf16.msra.mxu0 %v2995_v60 }
 0x3e8   : > { %2650 = vmatprep.subr.bf16.mxu0 %v3637_v52 }
 0x3eb   : > { %2651 = vmatpush3.bf16.msra.mxu0 %v2996_v61 }
 0x3ec   : > { %2704 = vmatprep.subr.bf16.mxu0 %v3637_v52 }
 0x3ee   : > { %2653 = vmatmul.mubr.bf16.vlgmr.msra.gmra.mrb[0].mxu0 %v832_v63 }
 0x3ef   : > { %2720 = vmatprep.mubr.msk.bf16.mxu0 %vm3638_vm0, %v3637_v52 }
 0x445   : > { %v1056_v27 = vpop.permute.xlu1 %1055 }
 0x446   : > { %v1061_v28 = vsel %vm948_vm1, %v1056_v27, 0 }
 0x4c1   : > { %v931_v0 = vpop.f32.mrb[0].mxu0 }
 0x4c2   : > { %v4210_v1 = vpack.c.bf16 %v931_v0, %v931_v0  ;;  %v2654_v2 = vpop.f32.mrb[1].mxu0 }
 0x4c3   : > { %v934_v3 = vpop.f32.mrb[2].mxu0 }
 0x4c4   : > { %1052 = vrot.lane.b32.xlu1 %v4210_v1, %s3639_s6  ;;  %v2655_v4 = vpop.f32.mrb[3].mxu0  ;;  %2659 = vmatmul.mubr.msk.bf16.vlgmr.msra.gmra.mrb[0].mxu1 %vm948_vm1, %v4210_v1 }
 0x4c5   : > { %2664 = vmatprep.mubr.msk.bf16.mxu1 %vm3638_vm0, %v3637_v52  ;;  %2663 = vmatpush3.bf16.msra.mxu1 %v4226_v23 }
 0x4c6   : > { %2668 = vmatprep.subr.bf16.mxu1 %v3637_v52 }
 0x536   : > { %v1053_v30 = vpop.permute.xlu1 %1052 }
 0x597   : > { %v989_v12 = vpop.f32.mrb[0].mxu1 }
 0x598   : > { %v990_v13 = vadd.f32 %v989_v12, %v4221_v11  ;;  %v2660_v14 = vpop.f32.mrb[1].mxu1 }
 0x599   : > { %v992_v15 = vpop.f32.mrb[2].mxu1 }
 0x59a   : > { %v2661_v16 = vpop.f32.mrb[3].mxu1  ;;  %v996_v17 = vsel %vm995_vm3, %v990_v13, -inf }
 0x59b   : > { %997 = vmax.xlane.f32.xlu0 %v996_v17 }
 0x628   : > { %v998_v18 = vpop.xlane.xlu0 %997 }
 0x629   : > { %v999_v19 = vsub.f32 %v990_v13, %v998_v18 }
 0x62b   : > { %v1000_v20 = vmul.f32 1.442695, %v999_v19 }
 0x62d   : > { %3085 = vpow2.f32 %v1000_v20 }
 0x637   : > { %v3086_v21 = vpop.eup %3085 }
 0x638   : > { %v1002_v22 = vsel %vm995_vm3, %v3086_v21, 0.0 }
 0x639   : > { %1003 = vadd.xlane.f32.xlu0 %v1002_v22 }
 0x6c6   : > { %v1004_v24 = vpop.xlane.xlu0 %1003 }
 0x6c7   : > { %3087 = vrcp.f32 %v1004_v24 }
 0x6d1   : > { %v3088_v25 = vpop.eup %3087 }
 0x6d2   : > { %v1006_v26 = vmul.f32 %v3088_v25, %v3086_v21 }
 0x6d4   : > { %v1007_v29 = vpack.c.bf16 %v1006_v26, %v1006_v26 }
 0x6d6   : > { %2665 = vmatmul.mubr.msk.bf16.vlgmr.msra.gmra.mrb[4].mxu1 %vm995_vm3, %v1007_v29 }
 0x6d7   : > { %2669 = vmatpush3.bf16.xpose.msra.mxu1 %v1061_v28  ;;  %2670 = vmatprep.mubr.msk.bf16.mxu1 %vm3638_vm0, %v3637_v52 }
 0x6d8   : > { %2674 = vmatprep.subr.bf16.mxu1 %v3637_v52 }
 0x6de   : > { %2671 = vmatmul.mubr.msk.bf16.vlgmr.msra.gmra.mrb[8].mxu1 %vm948_vm1, %v1053_v30 }
 0x6df   : > { %2676 = vmatprep.mubr.msk.bf16.mxu1 %vm3638_vm0, %v3637_v52 }
 0x7a9   : > { %v4238_v31 = vpop.f32.mrb[4].mxu1 }
 0x7aa   : > { %v2666_v32 = vpop.f32.mrb[5].mxu1 }
 0x7ab   : > { %v1048_v33 = vpop.f32.mrb[6].mxu1 }
 0x7ac   : > { %v2667_v34 = vpop.f32.mrb[7].mxu1 }
 0x7b1   : > { %v1097_v35 = vpop.f32.mrb[8].mxu1 }
 0x7b2   : > { %v1098_v36 = vadd.f32 %v1097_v35, %v4221_v11  ;;  %v2672_v37 = vpop.f32.mrb[9].mxu1 }
 0x7b3   : > { %v1100_v38 = vpop.f32.mrb[10].mxu1 }
 0x7b4   : > { %v2673_v39 = vpop.f32.mrb[11].mxu1  ;;  %v1103_v40 = vsel %vm995_vm3, %v1098_v36, -inf  ;;  %v2998_v38 = vld [vmem:[#allocation14 + $0x8] sm:$0xff]  }
 0x7b5   : > { %1104 = vmax.xlane.f32.xlu0 %v1103_v40  ;;  %v2999_v39 = vld [vmem:[#allocation14 + $0x10] sm:$0xff]   ;;  %v3000_v40 = vld [vmem:[#allocation14 + $0x18] sm:$0xff]  }
 0x7cb   : > { %1116 = vrot.lane.b32.xlu0 %v4226_v23, %s3639_s6 }
 0x7cf   : > { %1164 = vrot.lane.b32.xlu0 %v4190_v56, %s3641_s20 }
 0x7d3   : > { %1162 = vrot.lane.b32.xlu0 %v4210_v1, %s3641_s20 }
 0x842   : > { %v1105_v41 = vpop.xlane.xlu0 %1104 }
 0x843   : > { %v1106_v42 = vsub.f32 %v1098_v36, %v1105_v41  ;;  %v3001_v41 = vld [vmem:[#allocation14 + $0x20] sm:$0xff]  }
 0x845   : > { %v1107_v43 = vmul.f32 1.442695, %v1106_v42  ;;  %v3002_v42 = vld [vmem:[#allocation14 + $0x28] sm:$0xff]  }
 0x846   : > { %v1117_v44 = vpop.permute.xlu0 %1116 }
 0x847   : > { %3089 = vpow2.f32 %v1107_v43  ;;  %2675 = vmatpush3.bf16.msra.mxu1 %v1117_v44  ;;  %v3003_v43 = vld [vmem:[#allocation14 + $0x30] sm:$0xff]   ;;  %v3004_v44 = vld [vmem:[#allocation14 + $0x38] sm:$0xff]  }
 0x848   : > { %2680 = vmatprep.subr.bf16.mxu1 %v3637_v52 }
 0x84a   : > { %v1165_v50 = vpop.permute.xlu0 %1164 }
 0x84b   : > { %v1170_v51 = vsel %vm948_vm1, %v1165_v50, 0 }
 0x84e   : > { %v1163_v54 = vpop.permute.xlu0 %1162 }
 0x851   : > { %v3090_v45 = vpop.eup %3089 }
 0x852   : > { %v1109_v46 = vsel %vm995_vm3, %v3090_v45, 0.0 }
 0x853   : > { %1110 = vadd.xlane.f32.xlu1 %v1109_v46 }
 0x864   : > { %1224 = vrot.lane.b32.xlu1 %v4226_v23, %s3641_s20 }
 0x8e0   : > { %v1111_v47 = vpop.xlane.xlu1 %1110 }
 0x8e1   : > { %3091 = vrcp.f32 %v1111_v47 }
 0x8e4   : > { %v1225_v4 = vpop.permute.xlu1 %1224 }
 0x8eb   : > { %v3092_v48 = vpop.eup %3091 }
 0x8ec   : > { %v1113_v49 = vmul.f32 %v3092_v48, %v3090_v45 }
 0x8ee   : > { %v1114_v53 = vpack.c.bf16 %v1113_v49, %v1113_v49 }
 0x8f0   : > { %2677 = vmatmul.mubr.msk.bf16.vlgmr.msra.gmra.mrb[12].mxu1 %vm995_vm3, %v1114_v53 }
 0x8f1   : > { %2681 = vmatpush3.bf16.xpose.msra.mxu1 %v1170_v51  ;;  %2682 = vmatprep.mubr.msk.bf16.mxu1 %vm3638_vm0, %v3637_v52 }
 0x8f2   : > { %2686 = vmatprep.subr.bf16.mxu1 %v3637_v52 }
 0x8f8   : > { %2683 = vmatmul.mubr.msk.bf16.vlgmr.msra.gmra.mrb[16].mxu1 %vm948_vm1, %v1163_v54 }
 0x8f9   : > { %2688 = vmatprep.mubr.msk.bf16.mxu1 %vm3638_vm0, %v3637_v52  ;;  %2687 = vmatpush3.bf16.msra.mxu1 %v1225_v4  ;;  %v3008_v4 = vld [vmem:[#allocation20 + $0x8] ss:$16 sps:$4 sm:$0xff]  }
 0x8fa   : > { %2692 = vmatprep.subr.bf16.mxu1 %v3637_v52 }
 0x9c3   : > { %v1156_v55 = vpop.f32.mrb[12].mxu1 }
 0x9c4   : > { %v2678_v57 = vpop.f32.mrb[13].mxu1 }
 0x9c5   : > { %v1159_v58 = vpop.f32.mrb[14].mxu1 }
 0x9c6   : > { %v2679_v59 = vpop.f32.mrb[15].mxu1 }
 0x9cb   : > { %v1206_v60 = vpop.f32.mrb[16].mxu1 }
 0x9cc   : > { %v1207_v61 = vadd.f32 %v1206_v60, %v4221_v11  ;;  %v2684_v63 = vpop.f32.mrb[17].mxu1 }
 0x9cd   : > { %v1209_v0 = vpop.f32.mrb[18].mxu1 }
 0x9ce   : > { %v2685_v2 = vpop.f32.mrb[19].mxu1  ;;  %v1212_v3 = vsel %vm995_vm3, %v1207_v61, -inf }
 0x9cf   : > { %1213 = vmax.xlane.f32.xlu0 %v1212_v3  ;;  %v3005_v2 = vld [vmem:[#allocation20] ss:$16 sps:$4 sm:$0xff]   ;;  %v3007_v3 = vld [vmem:[#allocation20 + $0x4] ss:$16 sps:$4 sm:$0xff]  }
 0xa5c   : > { %v1214_v5 = vpop.xlane.xlu0 %1213 }
 0xa5d   : > { %v1215_v7 = vsub.f32 %v1207_v61, %v1214_v5  ;;  %v3010_v5 = vld [vmem:[#allocation20 + $0xc] ss:$16 sps:$4 sm:$0xff]  }
 0xa5f   : > { %v1216_v8 = vmul.f32 1.442695, %v1215_v7  ;;  %v3013_v7 = vld [vmem:[#allocation20 + $0x24] ss:$16 sps:$4 sm:$0xff]  }
 0xa61   : > { %3093 = vpow2.f32 %v1216_v8  ;;  %v3011_v8 = vld [vmem:[#allocation20 + $0x20] ss:$16 sps:$4 sm:$0xff]  }
 0xa6b   : > { %v3094_v9 = vpop.eup %3093 }
 0xa6c   : > { %v1218_v10 = vsel %vm995_vm3, %v3094_v9, 0.0 }
 0xa6d   : > { %1219 = vadd.xlane.f32.xlu1 %v1218_v10  ;;  %v3019_v10 = vld [vmem:[#allocation20 + $0x44] ss:$16 sps:$4 sm:$0xff]  }
 0xa7e   : > { %1272 = vrot.lane.b32.xlu1 %v4190_v56, %s3642_s25 }
 0xa82   : > { %1270 = vrot.lane.b32.xlu1 %v4210_v1, %s3642_s25 }
 0xafa   : > { %v1220_v12 = vpop.xlane.xlu1 %1219 }
 0xafb   : > { %3095 = vrcp.f32 %v1220_v12  ;;  %v3022_v12 = vld [vmem:[#allocation20 + $0x4c] ss:$16 sps:$4 sm:$0xff]  }
 0xafe   : > { %v1273_v15 = vpop.permute.xlu1 %1272 }
 0xaff   : > { %v1278_v16 = vsel %vm948_vm1, %v1273_v15, 0 }
 0xb02   : > { %v1271_v18 = vpop.permute.xlu1 %1270 }
 0xb05   : > { %v3096_v13 = vpop.eup %3095 }
 0xb06   : > { %v1222_v14 = vmul.f32 %v3096_v13, %v3094_v9  ;;  %v3014_v9 = vld [vmem:[#allocation20 + $0x28] ss:$16 sps:$4 sm:$0xff]   ;;  %v3017_v13 = vld [vmem:[#allocation20 + $0x40] ss:$16 sps:$4 sm:$0xff]  }
 0xb08   : > { %v1223_v17 = vpack.c.bf16 %v1222_v14, %v1222_v14 }
 0xb0a   : > { %2689 = vmatmul.mubr.msk.bf16.vlgmr.msra.gmra.mrb[20].mxu1 %vm995_vm3, %v1223_v17 }
 0xb0b   : > { %2693 = vmatpush3.bf16.xpose.msra.mxu1 %v1278_v16  ;;  %2694 = vmatprep.mubr.msk.bf16.mxu1 %vm3638_vm0, %v3637_v52 }
 0xb0c   : > { %2698 = vmatprep.subr.bf16.mxu1 %v3637_v52 }
 0xb12   : > { %2695 = vmatmul.mubr.msk.bf16.vlgmr.msra.gmra.mrb[24].mxu1 %vm948_vm1, %v1271_v18  ;;  %v3025_v18 = vld [vmem:[#allocation20 + $0x64] ss:$16 sps:$4 sm:$0xff]  }
 0xb13   : > { %2700 = vmatprep.mubr.msk.bf16.mxu1 %vm3638_vm0, %v3637_v52 }
 0xbdd   : > { %v1264_v56 = vpop.f32.mrb[20].mxu1 }
 0xbde   : > { %v2690_v1 = vpop.f32.mrb[21].mxu1 }
 0xbdf   : > { %v1267_v19 = vpop.f32.mrb[22].mxu1  ;;  %v3023_v1 = vld [vmem:[#allocation20 + $0x60] ss:$16 sps:$4 sm:$0xff]  }
 0xbe0   : > { %v2691_v20 = vpop.f32.mrb[23].mxu1  ;;  %v3026_v19 = vld [vmem:[#allocation20 + $0x68] ss:$16 sps:$4 sm:$0xff]  }
 0xbe1   : > { %v3031_v20 = vld [vmem:[#allocation20 + $0x84] ss:$16 sps:$4 sm:$0xff]  }
 0xbe5   : > { %v1314_v21 = vpop.f32.mrb[24].mxu1 }
 0xbe6   : > { %v1315_v22 = vadd.f32 %v1314_v21, %v4221_v11  ;;  %v2696_v24 = vpop.f32.mrb[25].mxu1  ;;  %v3034_v21 = vld [vmem:[#allocation20 + $0x8c] ss:$16 sps:$4 sm:$0xff]  }
 0xbe7   : > { %v1317_v25 = vpop.f32.mrb[26].mxu1  ;;  %v3032_v24 = vld [vmem:[#allocation20 + $0x88] ss:$16 sps:$4 sm:$0xff]  }
 0xbe8   : > { %v2697_v26 = vpop.f32.mrb[27].mxu1  ;;  %v1320_v27 = vsel %vm995_vm3, %v1315_v22, -inf  ;;  %v3037_v25 = vld [vmem:[#allocation20 + $0xa4] ss:$16 sps:$4 sm:$0xff]  }
 0xbe9   : > { %1321 = vmax.xlane.f32.xlu0 %v1320_v27  ;;  %v3040_v26 = vld [vmem:[#allocation20 + $0xac] ss:$16 sps:$4 sm:$0xff]   ;;  %v3035_v27 = vld [vmem:[#allocation20 + $0xa0] ss:$16 sps:$4 sm:$0xff]  }
 0xbff   : > { %1332 = vrot.lane.b32.xlu0 %v4226_v23, %s3642_s25  ;;  %v2997_v23 = vld [vmem:[#allocation14] sm:$0xff]  }
 0xc00   : > { %2705 = vmatpush3.bf16.msra.mxu0 %v2997_v23  ;;  %v3053_v23 = vld [vmem:[#allocation23 + $0x40] sm:$0xff]  }
 0xc01   : > { %2706 = vmatprep.subr.bf16.mxu0 %v3637_v52 }
 0xc03   : > { %1379 = vrot.lane.b32.xlu0 %v1156_v55, %s3642_s25  ;;  %s3469_s25 = scalar_lea.vmem %s4309_s19, 64 }
 0xc04   : > { %2707 = vmatpush3.bf16.msra.mxu0 %v2998_v38  ;;  %v3054_v38 = vld [vmem:[#allocation23 + $0xc0] sm:$0xff]   ;;  %p3470_p8 = scmp.ne.s32.totalorder %s4309_s19, %s3469_s25  ;;  %p3477_p6 = scmp.lt.s32.totalorder %s3475_s3, %s3469_s25 }
 0xc05   : > { %2708 = vmatprep.subr.bf16.mxu0 %v3637_v52 }
 0xc06   : > { %p3471_p12 = pnand %p3470_p8, %p4462_p9  ;;  %p3478_p5 = por %p3477_p6, %p3476_p7 }
 0xc07   : > { %1383 = vrot.lane.b32.xlu0 %v1264_v56, %s3641_s20  ;;  %v3028_v56 = vld [vmem:[#allocation20 + $0x6c] ss:$16 sps:$4 sm:$0xff]   ;;  %s4307_s20 = scalar_lea.hbm %s4461_s13, %s2550_s7 }
 0xc08   : > { %2709 = vmatpush3.bf16.msra.mxu0 %v2999_v39  ;;  %p3472_p4 = pneg %p3471_p12 }
 0xc09   : > { %2710 = vmatprep.subr.bf16.mxu0 %v3637_v52 }
 0xc0a   : > { %p3479_p11 = pnand %p3478_p5, %p3472_p4 }
 0xc0c   : > { %2711 = vmatpush3.bf16.msra.mxu0 %v3000_v40 }
 0xc0d   : > { %2712 = vmatprep.subr.bf16.mxu0 %v3637_v52 }
 0xc10   : > { %2713 = vmatpush3.bf16.msra.mxu0 %v3001_v41 }
 0xc11   : > { %2714 = vmatprep.subr.bf16.mxu0 %v3637_v52 }
 0xc14   : > { %2715 = vmatpush3.bf16.msra.mxu0 %v3002_v42 }
 0xc15   : > { %2716 = vmatprep.subr.bf16.mxu0 %v3637_v52 }
 0xc18   : > { %2717 = vmatpush3.bf16.msra.mxu0 %v3003_v43  ;;  %v2481_v43 = vld [vmem:[#allocation17] ss:$0 sm:$0xff] }
 0xc19   : > { %2718 = vmatprep.subr.bf16.mxu0 %v3637_v52  ;;  %v2472_v52 = vld [vmem:[#allocation16] ss:$0 sm:$0xff] }
 0xc1c   : > { %2719 = vmatpush3.bf16.msra.mxu0 %v3004_v44 }
 0xc1d   : > { %1792 = vmatprep.subr.bf16.mxu0 %v3010_v5  ;;  %v3072_v5 = vld [vmem:[#allocation23 + $0xa0] sm:$0xff]  }
 0xc76   : > { %v1322_v28 = vpop.xlane.xlu0 %1321 }
 0xc77   : > { %v1323_v29 = vsub.f32 %v1315_v22, %v1322_v28  ;;  %v3029_v22 = vld [vmem:[#allocation20 + $0x80] ss:$16 sps:$4 sm:$0xff]   ;;  %v3038_v28 = vld [vmem:[#allocation20 + $0xa8] ss:$16 sps:$4 sm:$0xff]  }
 0xc79   : > { %v1324_v30 = vmul.f32 1.442695, %v1323_v29  ;;  %v3043_v29 = vld [vmem:[#allocation20 + $0xc4] ss:$16 sps:$4 sm:$0xff]  }
 0xc7a   : > { %v1333_v32 = vpop.permute.xlu0 %1332 }
 0xc7b   : > { %3097 = vpow2.f32 %v1324_v30  ;;  %2699 = vmatpush3.bf16.msra.mxu1 %v1333_v32  ;;  %v3046_v30 = vld [vmem:[#allocation20 + $0xcc] ss:$16 sps:$4 sm:$0xff]   ;;  %v3041_v32 = vld [vmem:[#allocation20 + $0xc0] ss:$16 sps:$4 sm:$0xff]  }
 0xc7c   : > { %1751 = vmatprep.subr.bf16.mxu1 %v3007_v3  ;;  %v3070_v3 = vld [vmem:[#allocation23 + $0xe0] sm:$0xff]  }
 0xc7e   : > { %v1380_v49 = vpop.permute.xlu0 %1379 }
 0xc7f   : > { %v1390_v51 = vsel %vm948_vm1, %v4238_v31, %v1380_v49  ;;  %v3016_v31 = vld [vmem:[#allocation20 + $0x2c] ss:$16 sps:$4 sm:$0xff]   ;;  %v3056_v49 = vld [vmem:[#allocation23 + $0x80] sm:$0xff]  }
 0xc82   : > { %v1384_v50 = vpop.permute.xlu0 %1383 }
 0xc83   : > { %v1392_v53 = vsel %vm1391_vm4, %v1390_v51, %v1384_v50  ;;  %v3057_v51 = vld [vmem:[#allocation23 + $0x48] sm:$0xff]  }
 0xc85   : > { %v3098_v33 = vpop.eup %3097 }
 0xc86   : > { %v1326_v11 = vsel %vm995_vm3, %v3098_v33, 0.0 }
 0xc87   : > { %1327 = vadd.xlane.f32.xlu1 %v1326_v11  ;;  %v3047_v11 = vld [vmem:[#allocation20 + $0xe0] ss:$16 sps:$4 sm:$0xff]  }
 0xd14   : > { %v1328_v34 = vpop.xlane.xlu1 %1327 }
 0xd15   : > { %3099 = vrcp.f32 %v1328_v34  ;;  %v3049_v34 = vld [vmem:[#allocation20 + $0xe4] ss:$16 sps:$4 sm:$0xff]  }
 0xd1f   : > { %v3100_v35 = vpop.eup %3099 }
 0xd20   : > { %v1330_v36 = vmul.f32 %v3100_v35, %v3098_v33  ;;  %v3044_v33 = vld [vmem:[#allocation20 + $0xc8] ss:$16 sps:$4 sm:$0xff]  }
 0xd21   : > { %v3050_v35 = vld [vmem:[#allocation20 + $0xe8] ss:$16 sps:$4 sm:$0xff]  }
 0xd22   : > { %v1331_v37 = vpack.c.bf16 %v1330_v36, %v1330_v36  ;;  %v3052_v36 = vld [vmem:[#allocation20 + $0xec] ss:$16 sps:$4 sm:$0xff]  }
 0xd24   : > { %2701 = vmatmul.mubr.msk.bf16.vlgmr.msra.gmra.mrb[28].mxu1 %vm995_vm3, %v1331_v37  ;;  %v3643_v37 = vmov 0  }
 0xd25   : > { %1752 = vmatpush1.bf16.msra.mxu1 %v3005_v2  ;;  %1783 = vmatprep.mubr.bf16.mxu1 %v3643_v37  ;;  %v3069_v2 = vld [vmem:[#allocation23 + $0x60] sm:$0xff]  }
 0xd26   : > { %1753 = vmatprep.subr.bf16.mxu1 %v3013_v7  ;;  %v3073_v7 = vld [vmem:[#allocation23 + $0x68] sm:$0xff]  }
 0xd29   : > { %1754 = vmatpush1.bf16.msra.mxu1 %v3011_v8  ;;  %v3075_v8 = vld [vmem:[#allocation23 + $0x28] sm:$0xff]  }
 0xd2a   : > { %1755 = vmatprep.subr.bf16.mxu1 %v3019_v10  ;;  %v3077_v10 = vld [vmem:[#allocation23 + $0x70] sm:$0xff]  }
 0xd2d   : > { %1756 = vmatpush1.bf16.msra.mxu1 %v3017_v13  ;;  %v3079_v13 = vld [vmem:[#allocation23 + $0x30] sm:$0xff]  }
 0xd2e   : > { %1757 = vmatprep.subr.bf16.mxu1 %v3025_v18  ;;  %v1573_v18 = vsub.s32 0, %v4218_v6 }
 0xd31   : > { %1758 = vmatpush1.bf16.msra.mxu1 %v3023_v1  ;;  %v1569_v1 = vld [vmem:[#allocation22] sm:$0xf] }
 0xd32   : > { %1759 = vmatprep.subr.bf16.mxu1 %v3031_v20  ;;  %v1585_v20 = vsub.s32 3, %v4218_v6 }
 0xd35   : > { %1760 = vmatpush1.bf16.msra.mxu1 %v3029_v22 }
 0xd36   : > { %1761 = vmatprep.subr.bf16.mxu1 %v3037_v25  ;;  %v1586_v25 = vrot.slane %v1569_v1, %v1585_v20 }
 0xd39   : > { %1762 = vmatpush1.bf16.msra.mxu1 %v3035_v27 }
 0xd3a   : > { %1763 = vmatprep.subr.bf16.mxu1 %v3043_v29 }
 0xd3d   : > { %1764 = vmatpush1.bf16.msra.mxu1 %v3041_v32 }
 0xd3e   : > { %1765 = vmatprep.subr.bf16.mxu1 %v3049_v34 }
 0xd41   : > { %1766 = vmatpush1.bf16.msra.mxu1 %v3047_v11 }
 0xd42   : > { %2592 = vmatprep.subr.bf16.mxu1 %v3053_v23 }
 0xdf7   : > { %v1372_v45 = vpop.f32.mrb[28].mxu1 }
 0xdf8   : > { %1387 = vrot.lane.b32.xlu0 %v1372_v45, %s3639_s6  ;;  %v2702_v46 = vpop.f32.mrb[29].mxu1  ;;  %v2482_v45 = vld [vmem:[#allocation19] ss:$0 sm:$0xff] }
 0xdf9   : > { %v1375_v47 = vpop.f32.mrb[30].mxu1 }
 0xdfa   : > { %v2703_v48 = vpop.f32.mrb[31].mxu1 }
 0xdfb   : > { %v3055_v48 = vld [vmem:[#allocation23] sm:$0xff]  }
 0xe6a   : > { %v1388_v54 = vpop.permute.xlu0 %1387 }
 0xe6b   : > { %v1394_v55 = vsel %vm1393_vm5, %v1392_v53, %v1388_v54  ;;  %v3058_v53 = vld [vmem:[#allocation23 + $0xc8] sm:$0xff]  }
 0xe6c   : > { %v1395_v57 = vpack.c.bf16 %v1394_v55, %v1394_v55  ;;  %v3059_v54 = vld [vmem:[#allocation23 + $0x8] sm:$0xff]  }
 0xe6d   : > { %v3060_v55 = vld [vmem:[#allocation23 + $0x88] sm:$0xff]  }
 0xe6e   : > { %2721 = vmatmul.mubr.bf16.vlgmr.msra.gmra.mrb[4].mxu0 %v1395_v57  ;;  %v3061_v57 = vld [vmem:[#allocation23 + $0x50] sm:$0xff]  }
 0xe6f   : > { %1793 = vmatpush1.bf16.msra.mxu0 %v3008_v4  ;;  %1824 = vmatprep.mubr.bf16.mxu0 %v3643_v37  ;;  %v3071_v4 = vld [vmem:[#allocation23 + $0x20] sm:$0xff]  }
 0xe70   : > { %1794 = vmatprep.subr.bf16.mxu0 %v3016_v31  ;;  %v3074_v31 = vld [vmem:[#allocation23 + $0xe8] sm:$0xff]  }
 0xe73   : > { %1795 = vmatpush1.bf16.msra.mxu0 %v3014_v9  ;;  %v3076_v9 = vld [vmem:[#allocation23 + $0xa8] sm:$0xff]  }
 0xe74   : > { %1796 = vmatprep.subr.bf16.mxu0 %v3022_v12  ;;  %v3078_v12 = vld [vmem:[#allocation23 + $0xf0] sm:$0xff]  }
 0xf41   : > { %v1501_v58 = vpop.f32.mrb[4].mxu0 }
 0xf42   : > { %v1502_v59 = vadd.f32 %v2472_v52, %v1501_v58  ;;  %v2722_v60 = vpop.f32.mrb[5].mxu0  ;;  %v3062_v52 = vld [vmem:[#allocation23 + $0xd0] sm:$0xff]  }
 0xf43   : > { %v1504_v61 = vpop.f32.mrb[6].mxu0  ;;  %v3063_v58 = vld [vmem:[#allocation23 + $0x10] sm:$0xff]   ;;  %v3065_v60 = vld [vmem:[#allocation23 + $0x58] sm:$0xff]  }
 0xf44   : > { %v2723_v63 = vpop.f32.mrb[7].mxu0  ;;  %v1507_v0 = vadd.f32 %v1502_v59, %v4202_v62  ;;  %v3020_v62 = vld [vmem:[#allocation20 + $0x48] ss:$16 sps:$4 sm:$0xff]   ;;  %v3066_v61 = vld [vmem:[#allocation23 + $0xd8] sm:$0xff]  }
 0xf45   : > { %1797 = vmatpush1.bf16.msra.mxu0 %v3020_v62  ;;  %v3064_v59 = vld [vmem:[#allocation23 + $0x90] sm:$0xff]   ;;  %v3067_v63 = vld [vmem:[#allocation23 + $0x18] sm:$0xff]  }
 0xf46   : > { %1510 = vadd.xlane.f32.xlu1 %v1507_v0  ;;  %1798 = vmatprep.subr.bf16.mxu0 %v3028_v56  ;;  %v3080_v62 = vld [vmem:[#allocation23 + $0xb0] sm:$0xff]   ;;  %v1581_v56 = vsub.s32 2, %v4218_v6 }
 0xf48   : > { %v1582_v22 = vrot.slane %v1569_v1, %v1581_v56 }
 0xf49   : > { %1799 = vmatpush1.bf16.msra.mxu0 %v3026_v19  ;;  %v1577_v19 = vsub.s32 1, %v4218_v6 }
 0xf4a   : > { %1800 = vmatprep.subr.bf16.mxu0 %v3034_v21  ;;  %v1574_v21 = vrot.slane %v1569_v1, %v1573_v18 }
 0xf4d   : > { %1801 = vmatpush1.bf16.msra.mxu0 %v3032_v24  ;;  %v1578_v24 = vrot.slane %v1569_v1, %v1577_v19 }
 0xf4e   : > { %1802 = vmatprep.subr.bf16.mxu0 %v3040_v26 }
 0xf51   : > { %1803 = vmatpush1.bf16.msra.mxu0 %v3038_v28 }
 0xf52   : > { %1804 = vmatprep.subr.bf16.mxu0 %v3046_v30 }
 0xf55   : > { %1805 = vmatpush1.bf16.msra.mxu0 %v3044_v33 }
 0xf56   : > { %1806 = vmatprep.subr.bf16.mxu0 %v3052_v36 }
 0xf59   : > { %1807 = vmatpush1.bf16.msra.mxu0 %v3050_v35 }
 0xf5a   : > { %2614 = vmatprep.subr.bf16.mxu0 %v3054_v38 }
 0xfd3   : > { %v1511_v14 = vpop.xlane.xlu1 %1510 }
 0xfd4   : > { %v1513_v15 = vmul.f32 0.0078125, %v1511_v14  ;;  %v3081_v14 = vld [vmem:[#allocation23 + $0x78] sm:$0xff]  }
 0xfd6   : > { %v1514_v16 = vsub.f32 %v1507_v0, %v1513_v15  ;;  %v3068_v0 = vld [vmem:[#allocation23 + $0x98] sm:$0xff]  }
 0xfd7   : > { %v3082_v15 = vld [vmem:[#allocation23 + $0xf8] sm:$0xff]  }
 0xfd8   : > { %v1515_v17 = vmul.f32 %v1514_v16, %v1514_v16 }
 0xfda   : > { %1516 = vadd.xlane.f32.xlu0 %v1515_v17  ;;  %v3084_v17 = vld [vmem:[#allocation23 + $0xb8] sm:$0xff]  }
0x1067   : > { %v1517_v39 = vpop.xlane.xlu0 %1516 }
0x1068   : > { %v1518_v40 = vmul.f32 0.0078125, %v1517_v39 }
0x106a   : > { %v1519_v41 = vadd.f32 1e-05, %v1518_v40 }
0x106c   : > { %3101 = vrsqrt.f32 %v1519_v41 }
0x1076   : > { %v3102_v42 = vpop.eup %3101 }
0x1077   : > { %v1521_v44 = vmul.f32 %v3102_v42, %v1514_v16  ;;  %v3083_v16 = vld [vmem:[#allocation23 + $0x38] sm:$0xff]  }
0x1079   : > { %v1528_v46 = vmul.f32 %v2481_v43, %v1521_v44 }
0x107b   : > { %v4291_v47 = vadd.f32 %v2482_v45, %v1528_v46  ;;  %v2515_v46 = vld [vmem:[#allocation25] ss:$0 sm:$0xff] }
0x107d   : > { %v1536_v50 = vpack.c.bf16 %v4291_v47, %v4291_v47 }
0x107f   : > { %1784 = vmatmul.mubr.bf16.vlgmr.msra.gmra.mrb[32].mxu1 %v1536_v50  ;;  %1825 = vmatmul.mubr.bf16.vlgmr.msra.gmra.mrb[8].mxu0 %v1536_v50 }
0x1080   : > { %2593 = vmatpush3.bf16.msra.mxu1 %v3055_v48  ;;  %2615 = vmatpush3.bf16.msra.mxu0 %v3056_v49 }
0x1081   : > { %2594 = vmatprep.subr.bf16.mxu1 %v3057_v51  ;;  %2616 = vmatprep.subr.bf16.mxu0 %v3058_v53 }
0x1084   : > { %2595 = vmatpush3.bf16.msra.mxu1 %v3059_v54  ;;  %2617 = vmatpush3.bf16.msra.mxu0 %v3060_v55 }
0x1085   : > { %2596 = vmatprep.subr.bf16.mxu1 %v3061_v57  ;;  %2618 = vmatprep.subr.bf16.mxu0 %v3062_v52 }
0x1088   : > { %2597 = vmatpush3.bf16.msra.mxu1 %v3063_v58  ;;  %2619 = vmatpush3.bf16.msra.mxu0 %v3064_v59 }
0x1089   : > { %2598 = vmatprep.subr.bf16.mxu1 %v3065_v60  ;;  %2620 = vmatprep.subr.bf16.mxu0 %v3066_v61 }
0x108c   : > { %2599 = vmatpush3.bf16.msra.mxu1 %v3067_v63  ;;  %2621 = vmatpush3.bf16.msra.mxu0 %v3068_v0 }
0x108d   : > { %2600 = vmatprep.subr.bf16.mxu1 %v3069_v2  ;;  %2622 = vmatprep.subr.bf16.mxu0 %v3070_v3 }
0x1090   : > { %2601 = vmatpush3.bf16.msra.mxu1 %v3071_v4  ;;  %2623 = vmatpush3.bf16.msra.mxu0 %v3072_v5 }
0x1091   : > { %2602 = vmatprep.subr.bf16.mxu1 %v3073_v7  ;;  %2624 = vmatprep.subr.bf16.mxu0 %v3074_v31 }
0x1094   : > { %2603 = vmatpush3.bf16.msra.mxu1 %v3075_v8  ;;  %2625 = vmatpush3.bf16.msra.mxu0 %v3076_v9 }
0x1095   : > { %2604 = vmatprep.subr.bf16.mxu1 %v3077_v10  ;;  %2626 = vmatprep.subr.bf16.mxu0 %v3078_v12 }
0x1098   : > { %2605 = vmatpush3.bf16.msra.mxu1 %v3079_v13  ;;  %2627 = vmatpush3.bf16.msra.mxu0 %v3080_v62 }
0x1099   : > { %2606 = vmatprep.subr.bf16.mxu1 %v3081_v14  ;;  %2628 = vmatprep.subr.bf16.mxu0 %v3082_v15 }
0x109c   : > { %2607 = vmatpush3.bf16.msra.mxu1 %v3083_v16  ;;  %2629 = vmatpush3.bf16.msra.mxu0 %v3084_v17 }
0x1152   : > { %v1785_v26 = vpop.f32.mrb[32].mxu1  ;;  %v1826_v27 = vpop.f32.mrb[8].mxu0 }
0x1153   : > { %v1786_v28 = vadd.f32 %v1785_v26, %v1574_v21  ;;  %v1827_v29 = vadd.f32 %v1826_v27, %v1582_v22  ;;  %v1787_v30 = vpop.f32.mrb[33].mxu1  ;;  %v1828_v32 = vpop.f32.mrb[9].mxu0 }
0x1154   : > { %v1788_v33 = vadd.f32 %v1787_v30, %v1578_v24  ;;  %v1829_v11 = vadd.f32 %v1828_v32, %v1586_v25  ;;  %v1789_v34 = vpop.f32.mrb[34].mxu1  ;;  %v1830_v35 = vpop.f32.mrb[10].mxu0 }
0x1155   : > { %v1833_v36 = vmax.f32 %v1786_v28, 0.0  ;;  %v1835_v37 = vmax.f32 %v1827_v29, 0.0  ;;  %v1790_v23 = vpop.f32.mrb[35].mxu1  ;;  %v1831_v38 = vpop.f32.mrb[11].mxu0 }
0x1156   : > { %v1834_v6 = vmax.f32 %v1788_v33, 0.0  ;;  %v1836_v39 = vmax.f32 %v1829_v11, 0.0 }
0x1157   : > { %v1837_v42 = vpack.c.bf16 %v1833_v36, %v1833_v36  ;;  %v1839_v43 = vpack.c.bf16 %v1835_v37, %v1835_v37 }
0x1158   : > { %v1838_v40 = vpack.c.bf16 %v1834_v6, %v1834_v6  ;;  %v1840_v41 = vpack.c.bf16 %v1836_v39, %v1836_v39 }
0x115a   : > { %2136 = vmatprep.mubr.bf16.mxu1 %v1838_v40  ;;  %2176 = vmatprep.mubr.bf16.mxu0 %v1840_v41 }
0x115b   : > { %2137 = vmatmul.mubr.bf16.vlgmr.msra.gmra.mrb[36].mxu1 %v1837_v42  ;;  %2177 = vmatmul.mubr.bf16.vlgmr.msra.gmra.mrb[12].mxu0 %v1839_v43 }
0x122e   : > { %v2608_v44 = vpop.f32.mrb[36].mxu1  ;;  %v2630_v45 = vpop.f32.mrb[12].mxu0 }
0x122f   : > { %v2609_v48 = vpop.f32.mrb[37].mxu1  ;;  %v2631_v49 = vpop.f32.mrb[13].mxu0 }
0x1230   : > { %v2610_v50 = vadd.f32 %v2609_v48, %v2608_v44  ;;  %v2632_v51 = vadd.f32 %v2631_v49, %v2630_v45  ;;  %v2611_v53 = vpop.f32.mrb[38].mxu1  ;;  %v2633_v54 = vpop.f32.mrb[14].mxu0 }
0x1231   : > { %v2612_v55 = vpop.f32.mrb[39].mxu1  ;;  %v2634_v57 = vpop.f32.mrb[15].mxu0 }
0x1232   : > { %v2139_v52 = vadd.f32 %v2610_v50, %v2515_v46 }
0x1234   : > { %v2179_v58 = vadd.f32 %v2632_v51, %v2139_v52 }
0x1236   : > { %v2184_v59 = vadd.f32 %v2179_v58, %v4291_v47 }
0x1238   : > { %v2185_v60 = vpack.c.bf16 %v2184_v59, %v2184_v59 }
0x123a   : > { %2186 = vst [vmem:[%s632_s5] sm:$0xf] %v2185_v60 }
0x123b   : > { %3482 = shalt.err (!%p3479_p11)
}
0x123c   : > { %s3483_s28 = scalar_lea.hbm %s4307_s20, 64  ;;  %s3487_s26 = scalar_lea.hbm %s4461_s13, 256 }
0x123d   : > { %p3484_p1 = scmp.ne.s32.totalorder %s4307_s20, %s3483_s28  ;;  %p3488_p3 = scmp.lt.u32.totalorder %s4307_s20, %s4461_s13 }
0x123e   : > { %p3489_p2 = scmp.lt.u32.totalorder %s3487_s26, %s3483_s28  ;;  %p3491_p8 = scmp.lt.u32.totalorder %s3483_s28, %s4307_s20 }
0x123f   : > { %p3485_p13 = pnand %p3484_p1, %p4462_p9 }
0x1240   : > { %p3490_p10 = por %p3489_p2, %p3488_p3 }
0x1241   : > { %p3486_p0 = pneg %p3485_p13 }
0x1242   : > { %p3492_p12 = por %p3491_p8, %p3490_p10 }
0x1244   : > { %p3493_p4 = pnand %p3492_p12, %p3486_p0 }
0x1246   : > { %3496 = shalt.err (!%p3493_p4)
}
0x1247   : > { %2774 = dma.vmem_to_hbm [thread:$0]  (%p4462_p9), %s4309_s19, 64, %s4307_s20, %s2188_s29  }
0x1248 PF: > { %s4463_s14 = sld [smem:[#allocation35_spill]]  ;;  %p2846_p7 = scmp.ge.s32.totalorder %s3615_s18, 2 }
0x1249   : > { %p4464_p6 = scmp.ne.s32.totalorder %s4448_s4, 0 }
0x124b   : > { %p2818_p5 = pnand %p2846_p7, %p4464_p6 }
0x124e   : > { %s2215_s25 = sand.u32 1, %s4463_s14  }
0x124f   : > { %s2216_s21 = scalar_lea.sflag [#allocation7], %s2215_s25 }
0x1250   : > { %3570 = dma.done.wait (!%p2818_p5), %s2216_s21, 64  }
0x1251   : > { %3572 = vsyncadd (!%p2818_p5), %s2216_s21, 4294967232  ;;  %s35_s18 = sadd.s32 1, %s3615_s18   ;;  %s4465_s25 = sld [smem:[#allocation36_spill]] }
0x1252   : > { %p32_p11 = scmp.ge.s32.totalorder %s35_s18, 6   ;;  %s4466_s26 = sld [smem:[#allocation37_spill]] }
0x1253   : > { %s4467_s28 = sld [smem:[#allocation39_spill]]  ;;  %s4468_s27 = smov %s4482_s15 }
0x1254   : > { %s4469_s29 = smov %s3595_s30  ;;  %s4470_s30 = smov %s4086_s22 }
0x1255   : > { %s4471_s14 = smov %s3607_s16  ;;  %s4472_s15 = smov %s3611_s17 }
0x1256   : > { %s4473_s16 = smov %s4476_s0  ;;  %s4474_s17 = smov %s4480_s23 }
0x1257   :  { %34 = sbr.rel (!%p32_p11) target bundleno = 25 (0x19), region = 170 }
0x125e   :  { %2221 = vsyncpa [#allocation6], 1 }
0x125f   :  { %2223 = vsyncpa [#allocation6 + $0x1], 1 }
0x1260   :  { %2224 = vsyncpa [#allocation9], 1 }
0x1261   :  { %2225 = vsyncpa [#allocation12], 1 }
0x1262   :  { %2226 = vsyncpa [#allocation15], 1 }
0x1263   :  { %2227 = vsyncpa [#allocation18], 1 }
0x1264   :  { %2228 = vsyncpa [#allocation21], 1 }
0x1265   :  { %2229 = vsyncpa [#allocation24], 1 }
0x1266   :  { %2230 = vsyncpa [#allocation7], 1 }
0x1267   :  { %2232 = vsyncpa [#allocation7 + $0x1], 1 }

</bundles_post_ra>
